<compile_context>
chip_gen: v5e
topology: v5e:2x2
jax: 0.10.0
libtpu: 0.0.40
codegen_flags: <defaults>
</compile_context>

<pallas_src>
import functools

import jax
import jax.numpy as jnp
from jax.experimental import pallas as pl
from jax.experimental.pallas import tpu as pltpu

_LANE = 128
_VMEM_LIMIT = 48 * 1024 * 1024       # < 64 MiB so identical tiling fits v7x


def _round_up(x, m):
    return -(-x // m) * m


# ---------------------------------------------------------------------------
# Conv1d (+ReLU) as a tiled Pallas matmul with time on the lane axis
# ---------------------------------------------------------------------------
def _conv_mm_kernel(x_ref, w_ref, b_ref, o_ref, *, relu):
    # x_ref: (1, Q*Cin*stride, TT)  bf16   (pre-shifted phase patches)
    # w_ref: (Cout, Q*Cin*stride)   bf16
    # b_ref: (Cout, 1)              f32
    # o_ref: (1, Cout, TT)          f32   -> TT lanes: dense full-width stores
    acc = jnp.dot(w_ref[...], x_ref[0, :, :],
                  preferred_element_type=jnp.float32)
    acc = acc + b_ref[...]
    if relu:
        acc = jnp.maximum(acc, 0.0)
    o_ref[0, :, :] = acc


def conv1d_relu(x, w, b, *, stride, padding, relu=True, time_tile=512):
    """x: (B, Cin, Tin) f32, w: (Cout, Cin, K), b: (Cout,) -> (B, Cout, Tout)."""
    B, Cin, Tin = x.shape
    Cout, _, K = w.shape
    Tout = (Tin + 2 * padding - K) // stride + 1
    Q = -(-K // stride)                       # ceil(K / stride)
    CinS = Cin * stride

    TT = min(time_tile, _round_up(Tout, _LANE))   # lane-aligned time tile
    n_tt = -(-Tout // TT)
    Tout_pad = n_tt * TT
    Tu = Tout_pad + Q                         # phase-time length needed
    Tp = Tu * stride                          # padded raw-time length

    # Zero-pad raw time, then fold the conv stride into the channel axis
    # ("phases"):  xp[b, c*stride+r, u] = x_pad[b, c, u*stride + r]
    x_pad = jnp.pad(x, ((0, 0), (0, 0), (padding, Tp - padding - Tin)))
    xp = (x_pad.reshape(B, Cin, Tu, stride)
               .transpose(0, 1, 3, 2)
               .reshape(B, CinS, Tu))
    # Q shifted views stacked on the channel axis -> contraction dim Q*CinS.
    xq = jnp.concatenate([xp[:, :, q:q + Tout_pad] for q in range(Q)],
                         axis=1).astype(jnp.bfloat16)        # (B, Q*CinS, Tout_pad)

    # Matching weight layout: w_mat[cout, q*CinS + c*stride + r] = w[cout, c, q*stride+r]
    w_padded = jnp.pad(w, ((0, 0), (0, 0), (0, Q * stride - K)))
    w_mat = (w_padded.reshape(Cout, Cin, Q, stride)
                     .transpose(0, 2, 1, 3)
                     .reshape(Cout, Q * CinS)).astype(jnp.bfloat16)
    b_col = b.reshape(Cout, 1).astype(jnp.float32)

    out = pl.pallas_call(
        functools.partial(_conv_mm_kernel, relu=relu),
        out_shape=jax.ShapeDtypeStruct((B, Cout, Tout_pad), jnp.float32),
        grid=(B, n_tt),
        in_specs=[
            pl.BlockSpec((1, Q * CinS, TT), lambda bb, j: (bb, 0, j)),
            pl.BlockSpec((Cout, Q * CinS), lambda bb, j: (0, 0)),
            pl.BlockSpec((Cout, 1), lambda bb, j: (0, 0)),
        ],
        out_specs=pl.BlockSpec((1, Cout, TT), lambda bb, j: (bb, 0, j)),
        compiler_params=pltpu.CompilerParams(
            dimension_semantics=("parallel", "parallel"),
            vmem_limit_bytes=_VMEM_LIMIT),
    )(xq, w_mat, b_col)
    # TODO(synk): for configs where Q*Cin*stride is huge, add a K-tiled grid
    # axis with an f32 accumulator instead of a single contraction block.
    return out[:, :, :Tout]


# ---------------------------------------------------------------------------
# Fused projector + predictor + BYOL loss (both views) in ONE pallas_call
# ---------------------------------------------------------------------------
def _head_kernel(r1_ref, r2_ref,
                 w1_ref, b1_ref, g1_ref, be1_ref, w2_ref, b2_ref,
                 pw1_ref, pb1_ref, pg1_ref, pbe1_ref, pw2_ref, pb2_ref,
                 loss_ref, h1_acc, h2_acc):
    k = pl.program_id(0)

    @pl.when(k == 0)
    def _init():
        h1_acc[...] = jnp.zeros_like(h1_acc)
        h2_acc[...] = jnp.zeros_like(h2_acc)

    w1 = w1_ref[...]
    h1_acc[...] += jnp.dot(r1_ref[...], w1, preferred_element_type=jnp.float32)
    h2_acc[...] += jnp.dot(r2_ref[...], w1, preferred_element_type=jnp.float32)

    @pl.when(k == pl.num_programs(0) - 1)
    def _finalize():
        def bn_relu(h, g, be):
            # train-mode BatchNorm1d (biased batch variance), per view
            mu = jnp.mean(h, axis=0, keepdims=True)
            var = jnp.mean((h - mu) ** 2, axis=0, keepdims=True)
            return jnp.maximum(g * (h - mu) * jax.lax.rsqrt(var + 1e-5) + be,
                               0.0)

        def projector_tail(h):
            hh = bn_relu(h + b1_ref[...], g1_ref[...], be1_ref[...])
            return jnp.dot(hh.astype(jnp.bfloat16), w2_ref[...],
                           preferred_element_type=jnp.float32) + b2_ref[...]

        def predictor(z):
            h = jnp.dot(z.astype(jnp.bfloat16), pw1_ref[...],
                        preferred_element_type=jnp.float32) + pb1_ref[...]
            h = bn_relu(h, pg1_ref[...], pbe1_ref[...])
            return jnp.dot(h.astype(jnp.bfloat16), pw2_ref[...],
                           preferred_element_type=jnp.float32) + pb2_ref[...]

        proj1 = projector_tail(h1_acc[...])
        proj2 = projector_tail(h2_acc[...])
        pred1 = predictor(proj1)
        pred2 = predictor(proj2)

        def normalize(a):
            n = jnp.sqrt(jnp.sum(a * a, axis=-1, keepdims=True))
            return a / jnp.maximum(n, 1e-8)

        # byol_a_criterion(a, b) = 2 - 2 * cos_sim(a, b); loss = mean(l01 + l02)
        l1 = 2.0 - 2.0 * jnp.sum(normalize(pred1) * normalize(proj2),
                                 axis=-1, keepdims=True)
        l2 = 2.0 - 2.0 * jnp.sum(normalize(pred2) * normalize(proj1),
                                 axis=-1, keepdims=True)
        per_sample = l1 + l2                                  # (B, 1)
        loss_ref[...] = (jnp.sum(per_sample, axis=0, keepdims=True)
                         / per_sample.shape[0])


def fused_head(rep01, rep02, proj_params, pred_params, *, k_tile=2048):
    B, Din = rep01.shape
    w1, b1, g1, be1, w2, b2 = proj_params
    pw1, pb1, pg1, pbe1, pw2, pb2 = pred_params
    H = w1.shape[1]
    P = w2.shape[1]

    # Tile the Din (=F*T) contraction so w1 never has to be fully VMEM-resident.
    if Din % _LANE == 0:
        TK = min(k_tile, Din)
        while Din % TK:
            TK //= 2
    else:
        TK = Din
    nk = Din // TK

    const2 = lambda kk: (0, 0)
    loss = pl.pallas_call(
        _head_kernel,
        out_shape=jax.ShapeDtypeStruct((1, 1), jnp.float32),
        grid=(nk,),
        in_specs=[
            pl.BlockSpec((B, TK), lambda kk: (0, kk)),     # rep01
            pl.BlockSpec((B, TK), lambda kk: (0, kk)),     # rep02
            pl.BlockSpec((TK, H), lambda kk: (kk, 0)),     # projector w1
            pl.BlockSpec((1, H), const2),                  # projector b1
            pl.BlockSpec((1, H), const2),                  # projector bn gamma
            pl.BlockSpec((1, H), const2),                  # projector bn beta
            pl.BlockSpec((H, P), const2),                  # projector w2
            pl.BlockSpec((1, P), const2),                  # projector b2
            pl.BlockSpec((P, H), const2),                  # predictor w1
            pl.BlockSpec((1, H), const2),                  # predictor b1
            pl.BlockSpec((1, H), const2),                  # predictor bn gamma
            pl.BlockSpec((1, H), const2),                  # predictor bn beta
            pl.BlockSpec((H, P), const2),                  # predictor w2
            pl.BlockSpec((1, P), const2),                  # predictor b2
        ],
        out_specs=pl.BlockSpec((1, 1), const2),
        scratch_shapes=[pltpu.VMEM((B, H), jnp.float32),
                        pltpu.VMEM((B, H), jnp.float32)],
        compiler_params=pltpu.CompilerParams(
            dimension_semantics=("arbitrary",),
            vmem_limit_bytes=_VMEM_LIMIT),
    )(rep01.astype(jnp.bfloat16), rep02.astype(jnp.bfloat16),
      w1.astype(jnp.bfloat16), b1, g1, be1, w2.astype(jnp.bfloat16), b2,
      pw1.astype(jnp.bfloat16), pb1, pg1, pbe1, pw2.astype(jnp.bfloat16), pb2)
    return loss[0, 0]


# ---------------------------------------------------------------------------
# WaveBYOL forward (jitted end-to-end)
# ---------------------------------------------------------------------------
@functools.partial(jax.jit, static_argnames=("strides", "paddings"))
def _wavebyol_forward(params, x01, x02, *, strides, paddings):
    def pre_network(x):
        out = x
        for (w, b), s, p in zip(params["conv"], strides, paddings):
            out = conv1d_relu(out, w, b, stride=s, padding=p, relu=True)
        return out

    online_x01_pre = pre_network(x01)        # (B, F, T)
    online_x02_pre = pre_network(x02)

    B1, F1, T1 = online_x01_pre.shape
    B2, F2, T2 = online_x02_pre.shape
    # torch .reshape((B, T*F)) on a contiguous (B, F, T) tensor == row-major flatten
    rep01 = online_x01_pre.reshape(B1, F1 * T1)
    rep02 = online_x02_pre.reshape(B2, F2 * T2)

    loss = fused_head(rep01, rep02, params["proj"], params["pred"])

    # Target networks are deepcopies of the freshly initialised online networks
    # in this forward, so their outputs are numerically identical.
    # TODO(synk): after EMA/target updates the nets diverge; feed separate
    # target params here for a general training-time equivalent.
    target_x01_pre = jax.lax.stop_gradient(online_x01_pre)
    target_x02_pre = jax.lax.stop_gradient(online_x02_pre)

    online_representation = [(online_x01_pre, online_x02_pre)]
    target_representation = [(target_x01_pre, target_x02_pre)]
    return online_representation, target_representation, loss


class WaveBYOLPallas:
    def __init__(self, pre_input_dims, pre_hidden_dims, pre_filter_sizes,
                 pre_strides, pre_paddings, dimension, hidden_size,
                 projection_size, key):
        self.strides = tuple(pre_strides)
        self.paddings = tuple(pre_paddings)
        self.dimension = dimension

        n_keys = 2 * len(pre_hidden_dims) + 4
        keys = iter(jax.random.split(key, n_keys))

        conv_params = []
        in_dims = [pre_input_dims] + list(pre_hidden_dims[:-1])
        for cin, cout, k in zip(in_dims, pre_hidden_dims, pre_filter_sizes):
            w = 0.1 * jax.random.normal(next(keys), (cout, cin, k), jnp.float32)
            b = 0.01 * jax.random.normal(next(keys), (cout,), jnp.float32)
            conv_params.append((w, b))

        def mlp_params(din, h, dout):
            # biases / BN params pre-shaped (1, N) once (no per-call reshapes)
            w1 = 0.1 * jax.random.normal(next(keys), (din, h), jnp.float32)
            b1 = jnp.zeros((1, h), jnp.float32)
            g = jnp.ones((1, h), jnp.float32)
            be = jnp.zeros((1, h), jnp.float32)
            w2 = 0.1 * jax.random.normal(next(keys), (h, dout), jnp.float32)
            b2 = jnp.zeros((1, dout), jnp.float32)
            return (w1, b1, g, be, w2, b2)

        self.params = {
            "conv": conv_params,
            "proj": mlp_params(dimension, hidden_size, projection_size),
            "pred": mlp_params(projection_size, hidden_size, projection_size),
        }

    def forward(self, x01, x02):
        online_rep, target_rep, loss = _wavebyol_forward(
            self.params, x01, x02,
            strides=self.strides, paddings=self.paddings)
        B, F, T = online_rep[0][0].shape
        assert F * T == self.dimension
        return online_rep, target_rep, loss


# ---------------------------------------------------------------------------
if __name__ == "__main__":
    key = jax.random.PRNGKey(0)
    kx1, kx2, kparams = jax.random.split(key, 3)

    B, Cin, L = 2, 1, 64
    x01 = jax.random.normal(kx1, (B, Cin, L), dtype=jnp.float32)
    x02 = jax.random.normal(kx2, (B, Cin, L), dtype=jnp.float32)

    # Pre-network: 2 conv layers -> output (B, 8, 16) -> dimension = 128
    model = WaveBYOLPallas(
        pre_input_dims=1,
        pre_hidden_dims=[4, 8],
        pre_filter_sizes=[4, 4],
        pre_strides=[2, 2],
        pre_paddings=[1, 1],
        dimension=128,
        hidden_size=32,
        projection_size=16,
        key=kparams,
    )

    online_rep, target_rep, loss = model.forward(x01, x02)
    jax.block_until_ready(loss)
    jax.block_until_ready(online_rep[0][0])
    jax.block_until_ready(target_rep[0][0])
    print("KERNEL_OK")
</pallas_src>

<mosaic_0001>
module attributes {stable_mosaic.version = 11 : i64} {
  func.func @_conv_mm_kernel(%arg0: i32, %arg1: i32, %arg2: memref<1x16x128xbf16, #tpu.memory_space<vmem>>, %arg3: memref<8x16xbf16, #tpu.memory_space<vmem>>, %arg4: memref<8x1xf32, #tpu.memory_space<vmem>>, %arg5: memref<1x8x128xf32, #tpu.memory_space<vmem>>) attributes {dimension_semantics = [#tpu.dimension_semantics<parallel>, #tpu.dimension_semantics<parallel>], iteration_bounds = array<i64: 2, 1>, scalar_prefetch = 0 : i64, scratch_operands = 0 : i64, tpu.core_type = #tpu.core_type<tc>, window_params = [{transform_indices = @transform_0, window_bounds = array<i64: 1, 16, 128>}, {pipeline_mode = #tpu.pipeline_mode<synchronous>, transform_indices = @transform_1, window_bounds = array<i64: 8, 16>}, {pipeline_mode = #tpu.pipeline_mode<synchronous>, transform_indices = @transform_2, window_bounds = array<i64: 8, 1>}, {transform_indices = @transform_3, window_bounds = array<i64: 1, 8, 128>}]} {
    %c0 = arith.constant 0 : index
    %c0_0 = arith.constant 0 : index
    %0 = vector.load %arg3[%c0, %c0_0] : memref<8x16xbf16, #tpu.memory_space<vmem>>, vector<8x16xbf16>
    %c0_1 = arith.constant 0 : index
    %c0_2 = arith.constant 0 : index
    %c0_3 = arith.constant 0 : index
    %1 = vector.load %arg2[%c0_1, %c0_2, %c0_3] : memref<1x16x128xbf16, #tpu.memory_space<vmem>>, vector<1x16x128xbf16>
    %2 = vector.shape_cast %1 : vector<1x16x128xbf16> to vector<16x128xbf16>
    %cst = arith.constant dense<0.000000e+00> : vector<8x128xf32>
    %3 = tpu.matmul %0, %2, %cst {dimension_numbers = #tpu.dot_dimension_numbers<[1], [0], [0], [1], [0, 0, 1, 1], [], []>} : vector<8x16xbf16>, vector<16x128xbf16>, vector<8x128xf32> -> vector<8x128xf32>
    %c0_4 = arith.constant 0 : index
    %c0_5 = arith.constant 0 : index
    %4 = vector.load %arg4[%c0_4, %c0_5] : memref<8x1xf32, #tpu.memory_space<vmem>>, vector<8x1xf32>
    %5 = vector.broadcast %4 : vector<8x1xf32> to vector<8x128xf32>
    %6 = arith.addf %3, %5 : vector<8x128xf32>
    %cst_6 = arith.constant 0.000000e+00 : f32
    %7 = vector.broadcast %cst_6 : f32 to vector<8x128xf32>
    %8 = arith.maximumf %6, %7 : vector<8x128xf32>
    %c0_7 = arith.constant 0 : index
    %c0_8 = arith.constant 0 : index
    %c0_9 = arith.constant 0 : index
    %9 = vector.load %arg5[%c0_7, %c0_8, %c0_9] : memref<1x8x128xf32, #tpu.memory_space<vmem>>, vector<1x8x128xf32>
    %10 = vector.shape_cast %9 : vector<1x8x128xf32> to vector<8x128xf32>
    %11 = vector.shape_cast %8 : vector<8x128xf32> to vector<1x8x128xf32>
    tpu.vector_store %arg5[%c0_7, %c0_8, %c0_9], %11 {strides = array<i32>} : memref<1x8x128xf32, #tpu.memory_space<vmem>>, vector<1x8x128xf32>,
    return
  }
  func.func @transform_0(%arg0: i32, %arg1: i32) -> (i32, i32, i32) {
    %c0_i32 = arith.constant 0 : i32
    %c0_i32_0 = arith.constant 0 : i32
    return %arg0, %c0_i32, %arg1 : i32, i32, i32
  }
  func.func @transform_1(%arg0: i32, %arg1: i32) -> (i32, i32) {
    %c0_i32 = arith.constant 0 : i32
    %c0_i32_0 = arith.constant 0 : i32
    %c0_i32_1 = arith.constant 0 : i32
    return %c0_i32, %c0_i32_0 : i32, i32
  }
  func.func @transform_2(%arg0: i32, %arg1: i32) -> (i32, i32) {
    %c0_i32 = arith.constant 0 : i32
    %c0_i32_0 = arith.constant 0 : i32
    %c0_i32_1 = arith.constant 0 : i32
    return %c0_i32, %c0_i32_0 : i32, i32
  }
  func.func @transform_3(%arg0: i32, %arg1: i32) -> (i32, i32, i32) {
    %c0_i32 = arith.constant 0 : i32
    %c0_i32_0 = arith.constant 0 : i32
    return %arg0, %c0_i32, %arg1 : i32, i32, i32
  }
}

module attributes {stable_mosaic.version = 11 : i64} {
  func.func @_conv_mm_kernel(%arg0: i32, %arg1: i32, %arg2: memref<1x4x128xbf16, #tpu.memory_space<vmem>>, %arg3: memref<4x4xbf16, #tpu.memory_space<vmem>>, %arg4: memref<4x1xf32, #tpu.memory_space<vmem>>, %arg5: memref<1x4x128xf32, #tpu.memory_space<vmem>>) attributes {dimension_semantics = [#tpu.dimension_semantics<parallel>, #tpu.dimension_semantics<parallel>], iteration_bounds = array<i64: 2, 1>, scalar_prefetch = 0 : i64, scratch_operands = 0 : i64, tpu.core_type = #tpu.core_type<tc>, window_params = [{transform_indices = @transform_0, window_bounds = array<i64: 1, 4, 128>}, {pipeline_mode = #tpu.pipeline_mode<synchronous>, transform_indices = @transform_1, window_bounds = array<i64: 4, 4>}, {pipeline_mode = #tpu.pipeline_mode<synchronous>, transform_indices = @transform_2, window_bounds = array<i64: 4, 1>}, {transform_indices = @transform_3, window_bounds = array<i64: 1, 4, 128>}]} {
    %c0 = arith.constant 0 : index
    %c0_0 = arith.constant 0 : index
    %0 = vector.load %arg3[%c0, %c0_0] : memref<4x4xbf16, #tpu.memory_space<vmem>>, vector<4x4xbf16>
    %c0_1 = arith.constant 0 : index
    %c0_2 = arith.constant 0 : index
    %c0_3 = arith.constant 0 : index
    %1 = vector.load %arg2[%c0_1, %c0_2, %c0_3] : memref<1x4x128xbf16, #tpu.memory_space<vmem>>, vector<1x4x128xbf16>
    %2 = vector.shape_cast %1 : vector<1x4x128xbf16> to vector<4x128xbf16>
    %cst = arith.constant dense<0.000000e+00> : vector<4x128xf32>
    %3 = tpu.matmul %0, %2, %cst {dimension_numbers = #tpu.dot_dimension_numbers<[1], [0], [0], [1], [0, 0, 1, 1], [], []>} : vector<4x4xbf16>, vector<4x128xbf16>, vector<4x128xf32> -> vector<4x128xf32>
    %c0_4 = arith.constant 0 : index
    %c0_5 = arith.constant 0 : index
    %4 = vector.load %arg4[%c0_4, %c0_5] : memref<4x1xf32, #tpu.memory_space<vmem>>, vector<4x1xf32>
    %5 = vector.broadcast %4 : vector<4x1xf32> to vector<4x128xf32>
    %6 = arith.addf %3, %5 : vector<4x128xf32>
    %cst_6 = arith.constant 0.000000e+00 : f32
    %7 = vector.broadcast %cst_6 : f32 to vector<4x128xf32>
    %8 = arith.maximumf %6, %7 : vector<4x128xf32>
    %c0_7 = arith.constant 0 : index
    %c0_8 = arith.constant 0 : index
    %c0_9 = arith.constant 0 : index
    %9 = vector.load %arg5[%c0_7, %c0_8, %c0_9] : memref<1x4x128xf32, #tpu.memory_space<vmem>>, vector<1x4x128xf32>
    %10 = vector.shape_cast %9 : vector<1x4x128xf32> to vector<4x128xf32>
    %11 = vector.shape_cast %8 : vector<4x128xf32> to vector<1x4x128xf32>
    tpu.vector_store %arg5[%c0_7, %c0_8, %c0_9], %11 {strides = array<i32>} : memref<1x4x128xf32, #tpu.memory_space<vmem>>, vector<1x4x128xf32>,
    return
  }
  func.func @transform_0(%arg0: i32, %arg1: i32) -> (i32, i32, i32) {
    %c0_i32 = arith.constant 0 : i32
    %c0_i32_0 = arith.constant 0 : i32
    return %arg0, %c0_i32, %arg1 : i32, i32, i32
  }
  func.func @transform_1(%arg0: i32, %arg1: i32) -> (i32, i32) {
    %c0_i32 = arith.constant 0 : i32
    %c0_i32_0 = arith.constant 0 : i32
    %c0_i32_1 = arith.constant 0 : i32
    return %c0_i32, %c0_i32_0 : i32, i32
  }
  func.func @transform_2(%arg0: i32, %arg1: i32) -> (i32, i32) {
    %c0_i32 = arith.constant 0 : i32
    %c0_i32_0 = arith.constant 0 : i32
    %c0_i32_1 = arith.constant 0 : i32
    return %c0_i32, %c0_i32_0 : i32, i32
  }
  func.func @transform_3(%arg0: i32, %arg1: i32) -> (i32, i32, i32) {
    %c0_i32 = arith.constant 0 : i32
    %c0_i32_0 = arith.constant 0 : i32
    return %arg0, %c0_i32, %arg1 : i32, i32, i32
  }
}

module attributes {stable_mosaic.version = 11 : i64} {
  func.func @_head_kernel(%arg0: i32, %arg1: memref<2x128xbf16, #tpu.memory_space<vmem>>, %arg2: memref<2x128xbf16, #tpu.memory_space<vmem>>, %arg3: memref<128x32xbf16, #tpu.memory_space<vmem>>, %arg4: memref<1x32xf32, #tpu.memory_space<vmem>>, %arg5: memref<1x32xf32, #tpu.memory_space<vmem>>, %arg6: memref<1x32xf32, #tpu.memory_space<vmem>>, %arg7: memref<32x16xbf16, #tpu.memory_space<vmem>>, %arg8: memref<1x16xf32, #tpu.memory_space<vmem>>, %arg9: memref<16x32xbf16, #tpu.memory_space<vmem>>, %arg10: memref<1x32xf32, #tpu.memory_space<vmem>>, %arg11: memref<1x32xf32, #tpu.memory_space<vmem>>, %arg12: memref<1x32xf32, #tpu.memory_space<vmem>>, %arg13: memref<32x16xbf16, #tpu.memory_space<vmem>>, %arg14: memref<1x16xf32, #tpu.memory_space<vmem>>, %arg15: memref<1x1xf32, #tpu.memory_space<vmem>>, %arg16: memref<2x32xf32, #tpu.memory_space<vmem>>, %arg17: memref<2x32xf32, #tpu.memory_space<vmem>>) attributes {dimension_semantics = [#tpu.dimension_semantics<arbitrary>], iteration_bounds = array<i64: 1>, scalar_prefetch = 0 : i64, scratch_operands = 2 : i64, tpu.core_type = #tpu.core_type<tc>, window_params = [{transform_indices = @transform_0, window_bounds = array<i64: 2, 128>}, {transform_indices = @transform_1, window_bounds = array<i64: 2, 128>}, {transform_indices = @transform_2, window_bounds = array<i64: 128, 32>}, {pipeline_mode = #tpu.pipeline_mode<synchronous>, transform_indices = @transform_3, window_bounds = array<i64: 1, 32>}, {pipeline_mode = #tpu.pipeline_mode<synchronous>, transform_indices = @transform_4, window_bounds = array<i64: 1, 32>}, {pipeline_mode = #tpu.pipeline_mode<synchronous>, transform_indices = @transform_5, window_bounds = array<i64: 1, 32>}, {pipeline_mode = #tpu.pipeline_mode<synchronous>, transform_indices = @transform_6, window_bounds = array<i64: 32, 16>}, {pipeline_mode = #tpu.pipeline_mode<synchronous>, transform_indices = @transform_7, window_bounds = array<i64: 1, 16>}, {pipeline_mode = #tpu.pipeline_mode<synchronous>, transform_indices = @transform_8, window_bounds = array<i64: 16, 32>}, {pipeline_mode = #tpu.pipeline_mode<synchronous>, transform_indices = @transform_9, window_bounds = array<i64: 1, 32>}, {pipeline_mode = #tpu.pipeline_mode<synchronous>, transform_indices = @transform_10, window_bounds = array<i64: 1, 32>}, {pipeline_mode = #tpu.pipeline_mode<synchronous>, transform_indices = @transform_11, window_bounds = array<i64: 1, 32>}, {pipeline_mode = #tpu.pipeline_mode<synchronous>, transform_indices = @transform_12, window_bounds = array<i64: 32, 16>}, {pipeline_mode = #tpu.pipeline_mode<synchronous>, transform_indices = @transform_13, window_bounds = array<i64: 1, 16>}, {pipeline_mode = #tpu.pipeline_mode<synchronous>, transform_indices = @transform_14, window_bounds = array<i64: 1, 1>}]} {
    %c0_i32 = arith.constant 0 : i32
    %0 = arith.cmpi eq, %arg0, %c0_i32 : i32
    %1 = arith.extui %0 : i1 to i32
    %c0_i32_0 = arith.constant 0 : i32
    %2 = arith.cmpi ne, %1, %c0_i32_0 : i32
    scf.if %2 {
      %cst_17 = arith.constant 0.000000e+00 : f32
      %17 = vector.broadcast %cst_17 : f32 to vector<2x32xf32>
      %c0_18 = arith.constant 0 : index
      %c0_19 = arith.constant 0 : index
      %18 = vector.load %arg16[%c0_18, %c0_19] : memref<2x32xf32, #tpu.memory_space<vmem>>, vector<2x32xf32>
      tpu.vector_store %arg16[%c0_18, %c0_19], %17 {strides = array<i32>} : memref<2x32xf32, #tpu.memory_space<vmem>>, vector<2x32xf32>,
      %cst_20 = arith.constant 0.000000e+00 : f32
      %19 = vector.broadcast %cst_20 : f32 to vector<2x32xf32>
      %c0_21 = arith.constant 0 : index
      %c0_22 = arith.constant 0 : index
      %20 = vector.load %arg17[%c0_21, %c0_22] : memref<2x32xf32, #tpu.memory_space<vmem>>, vector<2x32xf32>
      tpu.vector_store %arg17[%c0_21, %c0_22], %19 {strides = array<i32>} : memref<2x32xf32, #tpu.memory_space<vmem>>, vector<2x32xf32>,
    } else {
    }
    %c0 = arith.constant 0 : index
    %c0_1 = arith.constant 0 : index
    %3 = vector.load %arg3[%c0, %c0_1] : memref<128x32xbf16, #tpu.memory_space<vmem>>, vector<128x32xbf16>
    %c0_2 = arith.constant 0 : index
    %c0_3 = arith.constant 0 : index
    %4 = vector.load %arg16[%c0_2, %c0_3] : memref<2x32xf32, #tpu.memory_space<vmem>>, vector<2x32xf32>
    %c0_4 = arith.constant 0 : index
    %c0_5 = arith.constant 0 : index
    %5 = vector.load %arg1[%c0_4, %c0_5] : memref<2x128xbf16, #tpu.memory_space<vmem>>, vector<2x128xbf16>
    %cst = arith.constant dense<0.000000e+00> : vector<2x32xf32>
    %6 = tpu.matmul %5, %3, %cst {dimension_numbers = #tpu.dot_dimension_numbers<[1], [0], [0], [1], [0, 0, 1, 1], [], []>} : vector<2x128xbf16>, vector<128x32xbf16>, vector<2x32xf32> -> vector<2x32xf32>
    %7 = arith.addf %4, %6 : vector<2x32xf32>
    %c0_6 = arith.constant 0 : index
    %c0_7 = arith.constant 0 : index
    %8 = vector.load %arg16[%c0_6, %c0_7] : memref<2x32xf32, #tpu.memory_space<vmem>>, vector<2x32xf32>
    tpu.vector_store %arg16[%c0_6, %c0_7], %7 {strides = array<i32>} : memref<2x32xf32, #tpu.memory_space<vmem>>, vector<2x32xf32>,
    %c0_8 = arith.constant 0 : index
    %c0_9 = arith.constant 0 : index
    %9 = vector.load %arg17[%c0_8, %c0_9] : memref<2x32xf32, #tpu.memory_space<vmem>>, vector<2x32xf32>
    %c0_10 = arith.constant 0 : index
    %c0_11 = arith.constant 0 : index
    %10 = vector.load %arg2[%c0_10, %c0_11] : memref<2x128xbf16, #tpu.memory_space<vmem>>, vector<2x128xbf16>
    %cst_12 = arith.constant dense<0.000000e+00> : vector<2x32xf32>
    %11 = tpu.matmul %10, %3, %cst_12 {dimension_numbers = #tpu.dot_dimension_numbers<[1], [0], [0], [1], [0, 0, 1, 1], [], []>} : vector<2x128xbf16>, vector<128x32xbf16>, vector<2x32xf32> -> vector<2x32xf32>
    %12 = arith.addf %9, %11 : vector<2x32xf32>
    %c0_13 = arith.constant 0 : index
    %c0_14 = arith.constant 0 : index
    %13 = vector.load %arg17[%c0_13, %c0_14] : memref<2x32xf32, #tpu.memory_space<vmem>>, vector<2x32xf32>
    tpu.vector_store %arg17[%c0_13, %c0_14], %12 {strides = array<i32>} : memref<2x32xf32, #tpu.memory_space<vmem>>, vector<2x32xf32>,
    %c0_i32_15 = arith.constant 0 : i32
    %14 = arith.cmpi eq, %arg0, %c0_i32_15 : i32
    %15 = arith.extui %14 : i1 to i32
    %c0_i32_16 = arith.constant 0 : i32
    %16 = arith.cmpi ne, %15, %c0_i32_16 : i32
    scf.if %16 {
      %c0_17 = arith.constant 0 : index
      %c0_18 = arith.constant 0 : index
      %17 = vector.load %arg16[%c0_17, %c0_18] : memref<2x32xf32, #tpu.memory_space<vmem>>, vector<2x32xf32>
      %c0_19 = arith.constant 0 : index
      %c0_20 = arith.constant 0 : index
      %18 = vector.load %arg4[%c0_19, %c0_20] : memref<1x32xf32, #tpu.memory_space<vmem>>, vector<1x32xf32>
      %19 = vector.broadcast %18 : vector<1x32xf32> to vector<2x32xf32>
      %20 = arith.addf %17, %19 : vector<2x32xf32>
      %c0_21 = arith.constant 0 : index
      %c0_22 = arith.constant 0 : index
      %21 = vector.load %arg5[%c0_21, %c0_22] : memref<1x32xf32, #tpu.memory_space<vmem>>, vector<1x32xf32>
      %c0_23 = arith.constant 0 : index
      %c0_24 = arith.constant 0 : index
      %22 = vector.load %arg6[%c0_23, %c0_24] : memref<1x32xf32, #tpu.memory_space<vmem>>, vector<1x32xf32>
      %cst_25 = arith.constant dense<0.000000e+00> : vector<32xf32>
      %23 = vector.multi_reduction <add>, %20, %cst_25 [0] : vector<2x32xf32> to vector<32xf32>
      %24 = vector.shape_cast %23 : vector<32xf32> to vector<1x32xf32>
      %cst_26 = arith.constant 2.000000e+00 : f32
      %25 = vector.broadcast %cst_26 : f32 to vector<1x32xf32>
      %26 = arith.divf %24, %25 : vector<1x32xf32>
      %27 = vector.broadcast %26 : vector<1x32xf32> to vector<2x32xf32>
      %28 = arith.subf %20, %27 : vector<2x32xf32>
      %29 = arith.mulf %28, %28 : vector<2x32xf32>
      %cst_27 = arith.constant dense<0.000000e+00> : vector<32xf32>
      %30 = vector.multi_reduction <add>, %29, %cst_27 [0] : vector<2x32xf32> to vector<32xf32>
      %31 = vector.shape_cast %30 : vector<32xf32> to vector<1x32xf32>
      %cst_28 = arith.constant 2.000000e+00 : f32
      %32 = vector.broadcast %cst_28 : f32 to vector<1x32xf32>
      %33 = arith.divf %31, %32 : vector<1x32xf32>
      %34 = vector.broadcast %26 : vector<1x32xf32> to vector<2x32xf32>
      %35 = arith.subf %20, %34 : vector<2x32xf32>
      %36 = vector.broadcast %21 : vector<1x32xf32> to vector<2x32xf32>
      %37 = arith.mulf %36, %35 : vector<2x32xf32>
      %cst_29 = arith.constant 9.99999974E-6 : f32
      %38 = vector.broadcast %cst_29 : f32 to vector<1x32xf32>
      %39 = arith.addf %33, %38 : vector<1x32xf32>
      %40 = math.rsqrt %39 : vector<1x32xf32>
      %41 = vector.broadcast %40 : vector<1x32xf32> to vector<2x32xf32>
      %42 = arith.mulf %37, %41 : vector<2x32xf32>
      %43 = vector.broadcast %22 : vector<1x32xf32> to vector<2x32xf32>
      %44 = arith.addf %42, %43 : vector<2x32xf32>
      %cst_30 = arith.constant 0.000000e+00 : f32
      %45 = vector.broadcast %cst_30 : f32 to vector<2x32xf32>
      %46 = arith.maximumf %44, %45 : vector<2x32xf32>
      %47 = arith.truncf %46 : vector<2x32xf32> to vector<2x32xbf16>
      %c0_31 = arith.constant 0 : index
      %c0_32 = arith.constant 0 : index
      %48 = vector.load %arg7[%c0_31, %c0_32] : memref<32x16xbf16, #tpu.memory_space<vmem>>, vector<32x16xbf16>
      %cst_33 = arith.constant dense<0.000000e+00> : vector<2x16xf32>
      %49 = tpu.matmul %47, %48, %cst_33 {dimension_numbers = #tpu.dot_dimension_numbers<[1], [0], [0], [1], [0, 0, 1, 1], [], []>} : vector<2x32xbf16>, vector<32x16xbf16>, vector<2x16xf32> -> vector<2x16xf32>
      %c0_34 = arith.constant 0 : index
      %c0_35 = arith.constant 0 : index
      %50 = vector.load %arg8[%c0_34, %c0_35] : memref<1x16xf32, #tpu.memory_space<vmem>>, vector<1x16xf32>
      %51 = vector.broadcast %50 : vector<1x16xf32> to vector<2x16xf32>
      %52 = arith.addf %49, %51 : vector<2x16xf32>
      %c0_36 = arith.constant 0 : index
      %c0_37 = arith.constant 0 : index
      %53 = vector.load %arg17[%c0_36, %c0_37] : memref<2x32xf32, #tpu.memory_space<vmem>>, vector<2x32xf32>
      %c0_38 = arith.constant 0 : index
      %c0_39 = arith.constant 0 : index
      %54 = vector.load %arg4[%c0_38, %c0_39] : memref<1x32xf32, #tpu.memory_space<vmem>>, vector<1x32xf32>
      %55 = vector.broadcast %54 : vector<1x32xf32> to vector<2x32xf32>
      %56 = arith.addf %53, %55 : vector<2x32xf32>
      %c0_40 = arith.constant 0 : index
      %c0_41 = arith.constant 0 : index
      %57 = vector.load %arg5[%c0_40, %c0_41] : memref<1x32xf32, #tpu.memory_space<vmem>>, vector<1x32xf32>
      %c0_42 = arith.constant 0 : index
      %c0_43 = arith.constant 0 : index
      %58 = vector.load %arg6[%c0_42, %c0_43] : memref<1x32xf32, #tpu.memory_space<vmem>>, vector<1x32xf32>
      %cst_44 = arith.constant dense<0.000000e+00> : vector<32xf32>
      %59 = vector.multi_reduction <add>, %56, %cst_44 [0] : vector<2x32xf32> to vector<32xf32>
      %60 = vector.shape_cast %59 : vector<32xf32> to vector<1x32xf32>
      %cst_45 = arith.constant 2.000000e+00 : f32
      %61 = vector.broadcast %cst_45 : f32 to vector<1x32xf32>
      %62 = arith.divf %60, %61 : vector<1x32xf32>
      %63 = vector.broadcast %62 : vector<1x32xf32> to vector<2x32xf32>
      %64 = arith.subf %56, %63 : vector<2x32xf32>
      %65 = arith.mulf %64, %64 : vector<2x32xf32>
      %cst_46 = arith.constant dense<0.000000e+00> : vector<32xf32>
      %66 = vector.multi_reduction <add>, %65, %cst_46 [0] : vector<2x32xf32> to vector<32xf32>
      %67 = vector.shape_cast %66 : vector<32xf32> to vector<1x32xf32>
      %cst_47 = arith.constant 2.000000e+00 : f32
      %68 = vector.broadcast %cst_47 : f32 to vector<1x32xf32>
      %69 = arith.divf %67, %68 : vector<1x32xf32>
      %70 = vector.broadcast %62 : vector<1x32xf32> to vector<2x32xf32>
      %71 = arith.subf %56, %70 : vector<2x32xf32>
      %72 = vector.broadcast %57 : vector<1x32xf32> to vector<2x32xf32>
      %73 = arith.mulf %72, %71 : vector<2x32xf32>
      %cst_48 = arith.constant 9.99999974E-6 : f32
      %74 = vector.broadcast %cst_48 : f32 to vector<1x32xf32>
      %75 = arith.addf %69, %74 : vector<1x32xf32>
      %76 = math.rsqrt %75 : vector<1x32xf32>
      %77 = vector.broadcast %76 : vector<1x32xf32> to vector<2x32xf32>
      %78 = arith.mulf %73, %77 : vector<2x32xf32>
      %79 = vector.broadcast %58 : vector<1x32xf32> to vector<2x32xf32>
      %80 = arith.addf %78, %79 : vector<2x32xf32>
      %cst_49 = arith.constant 0.000000e+00 : f32
      %81 = vector.broadcast %cst_49 : f32 to vector<2x32xf32>
      %82 = arith.maximumf %80, %81 : vector<2x32xf32>
      %83 = arith.truncf %82 : vector<2x32xf32> to vector<2x32xbf16>
      %c0_50 = arith.constant 0 : index
      %c0_51 = arith.constant 0 : index
      %84 = vector.load %arg7[%c0_50, %c0_51] : memref<32x16xbf16, #tpu.memory_space<vmem>>, vector<32x16xbf16>
      %cst_52 = arith.constant dense<0.000000e+00> : vector<2x16xf32>
      %85 = tpu.matmul %83, %84, %cst_52 {dimension_numbers = #tpu.dot_dimension_numbers<[1], [0], [0], [1], [0, 0, 1, 1], [], []>} : vector<2x32xbf16>, vector<32x16xbf16>, vector<2x16xf32> -> vector<2x16xf32>
      %c0_53 = arith.constant 0 : index
      %c0_54 = arith.constant 0 : index
      %86 = vector.load %arg8[%c0_53, %c0_54] : memref<1x16xf32, #tpu.memory_space<vmem>>, vector<1x16xf32>
      %87 = vector.broadcast %86 : vector<1x16xf32> to vector<2x16xf32>
      %88 = arith.addf %85, %87 : vector<2x16xf32>
      %89 = arith.truncf %52 : vector<2x16xf32> to vector<2x16xbf16>
      %c0_55 = arith.constant 0 : index
      %c0_56 = arith.constant 0 : index
      %90 = vector.load %arg9[%c0_55, %c0_56] : memref<16x32xbf16, #tpu.memory_space<vmem>>, vector<16x32xbf16>
      %cst_57 = arith.constant dense<0.000000e+00> : vector<2x32xf32>
      %91 = tpu.matmul %89, %90, %cst_57 {dimension_numbers = #tpu.dot_dimension_numbers<[1], [0], [0], [1], [0, 0, 1, 1], [], []>} : vector<2x16xbf16>, vector<16x32xbf16>, vector<2x32xf32> -> vector<2x32xf32>
      %c0_58 = arith.constant 0 : index
      %c0_59 = arith.constant 0 : index
      %92 = vector.load %arg10[%c0_58, %c0_59] : memref<1x32xf32, #tpu.memory_space<vmem>>, vector<1x32xf32>
      %93 = vector.broadcast %92 : vector<1x32xf32> to vector<2x32xf32>
      %94 = arith.addf %91, %93 : vector<2x32xf32>
      %c0_60 = arith.constant 0 : index
      %c0_61 = arith.constant 0 : index
      %95 = vector.load %arg11[%c0_60, %c0_61] : memref<1x32xf32, #tpu.memory_space<vmem>>, vector<1x32xf32>
      %c0_62 = arith.constant 0 : index
      %c0_63 = arith.constant 0 : index
      %96 = vector.load %arg12[%c0_62, %c0_63] : memref<1x32xf32, #tpu.memory_space<vmem>>, vector<1x32xf32>
      %cst_64 = arith.constant dense<0.000000e+00> : vector<32xf32>
      %97 = vector.multi_reduction <add>, %94, %cst_64 [0] : vector<2x32xf32> to vector<32xf32>
      %98 = vector.shape_cast %97 : vector<32xf32> to vector<1x32xf32>
      %cst_65 = arith.constant 2.000000e+00 : f32
      %99 = vector.broadcast %cst_65 : f32 to vector<1x32xf32>
      %100 = arith.divf %98, %99 : vector<1x32xf32>
      %101 = vector.broadcast %100 : vector<1x32xf32> to vector<2x32xf32>
      %102 = arith.subf %94, %101 : vector<2x32xf32>
      %103 = arith.mulf %102, %102 : vector<2x32xf32>
      %cst_66 = arith.constant dense<0.000000e+00> : vector<32xf32>
      %104 = vector.multi_reduction <add>, %103, %cst_66 [0] : vector<2x32xf32> to vector<32xf32>
      %105 = vector.shape_cast %104 : vector<32xf32> to vector<1x32xf32>
      %cst_67 = arith.constant 2.000000e+00 : f32
      %106 = vector.broadcast %cst_67 : f32 to vector<1x32xf32>
      %107 = arith.divf %105, %106 : vector<1x32xf32>
      %108 = vector.broadcast %100 : vector<1x32xf32> to vector<2x32xf32>
      %109 = arith.subf %94, %108 : vector<2x32xf32>
      %110 = vector.broadcast %95 : vector<1x32xf32> to vector<2x32xf32>
      %111 = arith.mulf %110, %109 : vector<2x32xf32>
      %cst_68 = arith.constant 9.99999974E-6 : f32
      %112 = vector.broadcast %cst_68 : f32 to vector<1x32xf32>
      %113 = arith.addf %107, %112 : vector<1x32xf32>
      %114 = math.rsqrt %113 : vector<1x32xf32>
      %115 = vector.broadcast %114 : vector<1x32xf32> to vector<2x32xf32>
      %116 = arith.mulf %111, %115 : vector<2x32xf32>
      %117 = vector.broadcast %96 : vector<1x32xf32> to vector<2x32xf32>
      %118 = arith.addf %116, %117 : vector<2x32xf32>
      %cst_69 = arith.constant 0.000000e+00 : f32
      %119 = vector.broadcast %cst_69 : f32 to vector<2x32xf32>
      %120 = arith.maximumf %118, %119 : vector<2x32xf32>
      %121 = arith.truncf %120 : vector<2x32xf32> to vector<2x32xbf16>
      %c0_70 = arith.constant 0 : index
      %c0_71 = arith.constant 0 : index
      %122 = vector.load %arg13[%c0_70, %c0_71] : memref<32x16xbf16, #tpu.memory_space<vmem>>, vector<32x16xbf16>
      %cst_72 = arith.constant dense<0.000000e+00> : vector<2x16xf32>
      %123 = tpu.matmul %121, %122, %cst_72 {dimension_numbers = #tpu.dot_dimension_numbers<[1], [0], [0], [1], [0, 0, 1, 1], [], []>} : vector<2x32xbf16>, vector<32x16xbf16>, vector<2x16xf32> -> vector<2x16xf32>
      %c0_73 = arith.constant 0 : index
      %c0_74 = arith.constant 0 : index
      %124 = vector.load %arg14[%c0_73, %c0_74] : memref<1x16xf32, #tpu.memory_space<vmem>>, vector<1x16xf32>
      %125 = vector.broadcast %124 : vector<1x16xf32> to vector<2x16xf32>
      %126 = arith.addf %123, %125 : vector<2x16xf32>
      %127 = arith.truncf %88 : vector<2x16xf32> to vector<2x16xbf16>
      %c0_75 = arith.constant 0 : index
      %c0_76 = arith.constant 0 : index
      %128 = vector.load %arg9[%c0_75, %c0_76] : memref<16x32xbf16, #tpu.memory_space<vmem>>, vector<16x32xbf16>
      %cst_77 = arith.constant dense<0.000000e+00> : vector<2x32xf32>
      %129 = tpu.matmul %127, %128, %cst_77 {dimension_numbers = #tpu.dot_dimension_numbers<[1], [0], [0], [1], [0, 0, 1, 1], [], []>} : vector<2x16xbf16>, vector<16x32xbf16>, vector<2x32xf32> -> vector<2x32xf32>
      %c0_78 = arith.constant 0 : index
      %c0_79 = arith.constant 0 : index
      %130 = vector.load %arg10[%c0_78, %c0_79] : memref<1x32xf32, #tpu.memory_space<vmem>>, vector<1x32xf32>
      %131 = vector.broadcast %130 : vector<1x32xf32> to vector<2x32xf32>
      %132 = arith.addf %129, %131 : vector<2x32xf32>
      %c0_80 = arith.constant 0 : index
      %c0_81 = arith.constant 0 : index
      %133 = vector.load %arg11[%c0_80, %c0_81] : memref<1x32xf32, #tpu.memory_space<vmem>>, vector<1x32xf32>
      %c0_82 = arith.constant 0 : index
      %c0_83 = arith.constant 0 : index
      %134 = vector.load %arg12[%c0_82, %c0_83] : memref<1x32xf32, #tpu.memory_space<vmem>>, vector<1x32xf32>
      %cst_84 = arith.constant dense<0.000000e+00> : vector<32xf32>
      %135 = vector.multi_reduction <add>, %132, %cst_84 [0] : vector<2x32xf32> to vector<32xf32>
      %136 = vector.shape_cast %135 : vector<32xf32> to vector<1x32xf32>
      %cst_85 = arith.constant 2.000000e+00 : f32
      %137 = vector.broadcast %cst_85 : f32 to vector<1x32xf32>
      %138 = arith.divf %136, %137 : vector<1x32xf32>
      %139 = vector.broadcast %138 : vector<1x32xf32> to vector<2x32xf32>
      %140 = arith.subf %132, %139 : vector<2x32xf32>
      %141 = arith.mulf %140, %140 : vector<2x32xf32>
      %cst_86 = arith.constant dense<0.000000e+00> : vector<32xf32>
      %142 = vector.multi_reduction <add>, %141, %cst_86 [0] : vector<2x32xf32> to vector<32xf32>
      %143 = vector.shape_cast %142 : vector<32xf32> to vector<1x32xf32>
      %cst_87 = arith.constant 2.000000e+00 : f32
      %144 = vector.broadcast %cst_87 : f32 to vector<1x32xf32>
      %145 = arith.divf %143, %144 : vector<1x32xf32>
      %146 = vector.broadcast %138 : vector<1x32xf32> to vector<2x32xf32>
      %147 = arith.subf %132, %146 : vector<2x32xf32>
      %148 = vector.broadcast %133 : vector<1x32xf32> to vector<2x32xf32>
      %149 = arith.mulf %148, %147 : vector<2x32xf32>
      %cst_88 = arith.constant 9.99999974E-6 : f32
      %150 = vector.broadcast %cst_88 : f32 to vector<1x32xf32>
      %151 = arith.addf %145, %150 : vector<1x32xf32>
      %152 = math.rsqrt %151 : vector<1x32xf32>
      %153 = vector.broadcast %152 : vector<1x32xf32> to vector<2x32xf32>
      %154 = arith.mulf %149, %153 : vector<2x32xf32>
      %155 = vector.broadcast %134 : vector<1x32xf32> to vector<2x32xf32>
      %156 = arith.addf %154, %155 : vector<2x32xf32>
      %cst_89 = arith.constant 0.000000e+00 : f32
      %157 = vector.broadcast %cst_89 : f32 to vector<2x32xf32>
      %158 = arith.maximumf %156, %157 : vector<2x32xf32>
      %159 = arith.truncf %158 : vector<2x32xf32> to vector<2x32xbf16>
      %c0_90 = arith.constant 0 : index
      %c0_91 = arith.constant 0 : index
      %160 = vector.load %arg13[%c0_90, %c0_91] : memref<32x16xbf16, #tpu.memory_space<vmem>>, vector<32x16xbf16>
      %cst_92 = arith.constant dense<0.000000e+00> : vector<2x16xf32>
      %161 = tpu.matmul %159, %160, %cst_92 {dimension_numbers = #tpu.dot_dimension_numbers<[1], [0], [0], [1], [0, 0, 1, 1], [], []>} : vector<2x32xbf16>, vector<32x16xbf16>, vector<2x16xf32> -> vector<2x16xf32>
      %c0_93 = arith.constant 0 : index
      %c0_94 = arith.constant 0 : index
      %162 = vector.load %arg14[%c0_93, %c0_94] : memref<1x16xf32, #tpu.memory_space<vmem>>, vector<1x16xf32>
      %163 = vector.broadcast %162 : vector<1x16xf32> to vector<2x16xf32>
      %164 = arith.addf %161, %163 : vector<2x16xf32>
      %165 = arith.mulf %126, %126 : vector<2x16xf32>
      %cst_95 = arith.constant dense<0.000000e+00> : vector<2xf32>
      %166 = vector.multi_reduction <add>, %165, %cst_95 [1] : vector<2x16xf32> to vector<2xf32>
      %167 = vector.shape_cast %166 : vector<2xf32> to vector<2x1xf32>
      %168 = math.sqrt %167 : vector<2x1xf32>
      %cst_96 = arith.constant 9.99999993E-9 : f32
      %169 = vector.broadcast %cst_96 : f32 to vector<2x1xf32>
      %170 = arith.maximumf %168, %169 : vector<2x1xf32>
      %171 = vector.broadcast %170 : vector<2x1xf32> to vector<2x16xf32>
      %172 = arith.divf %126, %171 : vector<2x16xf32>
      %173 = arith.mulf %88, %88 : vector<2x16xf32>
      %cst_97 = arith.constant dense<0.000000e+00> : vector<2xf32>
      %174 = vector.multi_reduction <add>, %173, %cst_97 [1] : vector<2x16xf32> to vector<2xf32>
      %175 = vector.shape_cast %174 : vector<2xf32> to vector<2x1xf32>
      %176 = math.sqrt %175 : vector<2x1xf32>
      %cst_98 = arith.constant 9.99999993E-9 : f32
      %177 = vector.broadcast %cst_98 : f32 to vector<2x1xf32>
      %178 = arith.maximumf %176, %177 : vector<2x1xf32>
      %179 = vector.broadcast %178 : vector<2x1xf32> to vector<2x16xf32>
      %180 = arith.divf %88, %179 : vector<2x16xf32>
      %181 = arith.mulf %172, %180 : vector<2x16xf32>
      %cst_99 = arith.constant dense<0.000000e+00> : vector<2xf32>
      %182 = vector.multi_reduction <add>, %181, %cst_99 [1] : vector<2x16xf32> to vector<2xf32>
      %183 = vector.shape_cast %182 : vector<2xf32> to vector<2x1xf32>
      %cst_100 = arith.constant 2.000000e+00 : f32
      %184 = vector.broadcast %cst_100 : f32 to vector<2x1xf32>
      %185 = arith.mulf %184, %183 : vector<2x1xf32>
      %cst_101 = arith.constant 2.000000e+00 : f32
      %186 = vector.broadcast %cst_101 : f32 to vector<2x1xf32>
      %187 = arith.subf %186, %185 : vector<2x1xf32>
      %188 = arith.mulf %164, %164 : vector<2x16xf32>
      %cst_102 = arith.constant dense<0.000000e+00> : vector<2xf32>
      %189 = vector.multi_reduction <add>, %188, %cst_102 [1] : vector<2x16xf32> to vector<2xf32>
      %190 = vector.shape_cast %189 : vector<2xf32> to vector<2x1xf32>
      %191 = math.sqrt %190 : vector<2x1xf32>
      %cst_103 = arith.constant 9.99999993E-9 : f32
      %192 = vector.broadcast %cst_103 : f32 to vector<2x1xf32>
      %193 = arith.maximumf %191, %192 : vector<2x1xf32>
      %194 = vector.broadcast %193 : vector<2x1xf32> to vector<2x16xf32>
      %195 = arith.divf %164, %194 : vector<2x16xf32>
      %196 = arith.mulf %52, %52 : vector<2x16xf32>
      %cst_104 = arith.constant dense<0.000000e+00> : vector<2xf32>
      %197 = vector.multi_reduction <add>, %196, %cst_104 [1] : vector<2x16xf32> to vector<2xf32>
      %198 = vector.shape_cast %197 : vector<2xf32> to vector<2x1xf32>
      %199 = math.sqrt %198 : vector<2x1xf32>
      %cst_105 = arith.constant 9.99999993E-9 : f32
      %200 = vector.broadcast %cst_105 : f32 to vector<2x1xf32>
      %201 = arith.maximumf %199, %200 : vector<2x1xf32>
      %202 = vector.broadcast %201 : vector<2x1xf32> to vector<2x16xf32>
      %203 = arith.divf %52, %202 : vector<2x16xf32>
      %204 = arith.mulf %195, %203 : vector<2x16xf32>
      %cst_106 = arith.constant dense<0.000000e+00> : vector<2xf32>
      %205 = vector.multi_reduction <add>, %204, %cst_106 [1] : vector<2x16xf32> to vector<2xf32>
      %206 = vector.shape_cast %205 : vector<2xf32> to vector<2x1xf32>
      %cst_107 = arith.constant 2.000000e+00 : f32
      %207 = vector.broadcast %cst_107 : f32 to vector<2x1xf32>
      %208 = arith.mulf %207, %206 : vector<2x1xf32>
      %cst_108 = arith.constant 2.000000e+00 : f32
      %209 = vector.broadcast %cst_108 : f32 to vector<2x1xf32>
      %210 = arith.subf %209, %208 : vector<2x1xf32>
      %211 = arith.addf %187, %210 : vector<2x1xf32>
      %cst_109 = arith.constant dense<0.000000e+00> : vector<1xf32>
      %212 = vector.multi_reduction <add>, %211, %cst_109 [0] : vector<2x1xf32> to vector<1xf32>
      %213 = vector.shape_cast %212 : vector<1xf32> to vector<1x1xf32>
      %cst_110 = arith.constant 2.000000e+00 : f32
      %214 = vector.broadcast %cst_110 : f32 to vector<1x1xf32>
      %215 = arith.divf %213, %214 : vector<1x1xf32>
      %c0_111 = arith.constant 0 : index
      %c0_112 = arith.constant 0 : index
      %216 = vector.load %arg15[%c0_111, %c0_112] : memref<1x1xf32, #tpu.memory_space<vmem>>, vector<1x1xf32>
      tpu.vector_store %arg15[%c0_111, %c0_112], %215 {strides = array<i32>} : memref<1x1xf32, #tpu.memory_space<vmem>>, vector<1x1xf32>,
    } else {
    }
    return
  }
  func.func @transform_0(%arg0: i32) -> (i32, i32) {
    %c0_i32 = arith.constant 0 : i32
    %c0_i32_0 = arith.constant 0 : i32
    return %c0_i32, %arg0 : i32, i32
  }
  func.func @transform_1(%arg0: i32) -> (i32, i32) {
    %c0_i32 = arith.constant 0 : i32
    %c0_i32_0 = arith.constant 0 : i32
    return %c0_i32, %arg0 : i32, i32
  }
  func.func @transform_2(%arg0: i32) -> (i32, i32) {
    %c0_i32 = arith.constant 0 : i32
    %c0_i32_0 = arith.constant 0 : i32
    return %arg0, %c0_i32 : i32, i32
  }
  func.func @transform_3(%arg0: i32) -> (i32, i32) {
    %c0_i32 = arith.constant 0 : i32
    %c0_i32_0 = arith.constant 0 : i32
    %c0_i32_1 = arith.constant 0 : i32
    return %c0_i32, %c0_i32_0 : i32, i32
  }
  func.func @transform_4(%arg0: i32) -> (i32, i32) {
    %c0_i32 = arith.constant 0 : i32
    %c0_i32_0 = arith.constant 0 : i32
    %c0_i32_1 = arith.constant 0 : i32
    return %c0_i32, %c0_i32_0 : i32, i32
  }
  func.func @transform_5(%arg0: i32) -> (i32, i32) {
    %c0_i32 = arith.constant 0 : i32
    %c0_i32_0 = arith.constant 0 : i32
    %c0_i32_1 = arith.constant 0 : i32
    return %c0_i32, %c0_i32_0 : i32, i32
  }
  func.func @transform_6(%arg0: i32) -> (i32, i32) {
    %c0_i32 = arith.constant 0 : i32
    %c0_i32_0 = arith.constant 0 : i32
    %c0_i32_1 = arith.constant 0 : i32
    return %c0_i32, %c0_i32_0 : i32, i32
  }
  func.func @transform_7(%arg0: i32) -> (i32, i32) {
    %c0_i32 = arith.constant 0 : i32
    %c0_i32_0 = arith.constant 0 : i32
    %c0_i32_1 = arith.constant 0 : i32
    return %c0_i32, %c0_i32_0 : i32, i32
  }
  func.func @transform_8(%arg0: i32) -> (i32, i32) {
    %c0_i32 = arith.constant 0 : i32
    %c0_i32_0 = arith.constant 0 : i32
    %c0_i32_1 = arith.constant 0 : i32
    return %c0_i32, %c0_i32_0 : i32, i32
  }
  func.func @transform_9(%arg0: i32) -> (i32, i32) {
    %c0_i32 = arith.constant 0 : i32
    %c0_i32_0 = arith.constant 0 : i32
    %c0_i32_1 = arith.constant 0 : i32
    return %c0_i32, %c0_i32_0 : i32, i32
  }
  func.func @transform_10(%arg0: i32) -> (i32, i32) {
    %c0_i32 = arith.constant 0 : i32
    %c0_i32_0 = arith.constant 0 : i32
    %c0_i32_1 = arith.constant 0 : i32
    return %c0_i32, %c0_i32_0 : i32, i32
  }
  func.func @transform_11(%arg0: i32) -> (i32, i32) {
    %c0_i32 = arith.constant 0 : i32
    %c0_i32_0 = arith.constant 0 : i32
    %c0_i32_1 = arith.constant 0 : i32
    return %c0_i32, %c0_i32_0 : i32, i32
  }
  func.func @transform_12(%arg0: i32) -> (i32, i32) {
    %c0_i32 = arith.constant 0 : i32
    %c0_i32_0 = arith.constant 0 : i32
    %c0_i32_1 = arith.constant 0 : i32
    return %c0_i32, %c0_i32_0 : i32, i32
  }
  func.func @transform_13(%arg0: i32) -> (i32, i32) {
    %c0_i32 = arith.constant 0 : i32
    %c0_i32_0 = arith.constant 0 : i32
    %c0_i32_1 = arith.constant 0 : i32
    return %c0_i32, %c0_i32_0 : i32, i32
  }
  func.func @transform_14(%arg0: i32) -> (i32, i32) {
    %c0_i32 = arith.constant 0 : i32
    %c0_i32_0 = arith.constant 0 : i32
    %c0_i32_1 = arith.constant 0 : i32
    return %c0_i32, %c0_i32_0 : i32, i32
  }
}

</mosaic_0001>

<bundles_post_ra>
// kernel: _wavebyol_forward.8
= control target key start
LH: loop header
LB: loop body
LE: loop exit
PB: predicated region body
PF: predicated region fallthrough
CT: control target
= control target key end

     0   :  { %s400_s12 = smov 0   ;;  %s402_s13 = smov 0   ;;  %s436_s0 = inlined_call_operand.vmem [shape: bf16[2,16,128], index: 0, kind: input, shape index: {}]   ;;  %s437_s1 = inlined_call_operand.vmem [shape: bf16[8,16], index: 1, kind: input, shape index: {}]   ;;  %s438_s2 = inlined_call_operand.vmem [shape: f32[8,1], index: 2, kind: input, shape index: {}]   ;;  %s439_s3 = inlined_call_operand.vmem [shape: f32[2,8,128], index: 3, kind: output, shape index: {}]  }
   0x1   :  { %s404_s14 = smov 0  }
   0x2 LB: > { %s25_s15 = sadd.s32 1, %s373_s13  ;;  %p316_p0 = scmp.ge.s32.totalorder %s377_s14, 1  ;;  %s377_s14 = sphi %s404_s14, %s13_s14   ;;  %s373_s13 = sphi %s402_s13, %s441_s13   ;;  %s369_s12 = sphi %s400_s12, %s440_s12  }
   0x3   : > { %p27_p1 = scmp.ge.s32.totalorder %s25_s15, 2  ;;  %p156_p2 = scmp.lt.s32.totalorder %s377_s14, 3 }
   0x5   : > { %s443_s15 = smov (%p27_p1, %s25_s15), 0  ;;  %p157_p3 = pnand %p316_p0, %p156_p2 }
   0x6   : > { %p185_p4 = scmp.lt.s32.totalorder (!%p157_p3), %s369_s12, 1 }
   0x7   : > { %160 = sbr.rel (%p157_p3) target bundleno = 153 (0x99), region = 32 }
   0xc   : > { %v204_v0 = vld [vmem:[%s438_s2] sm:$0xff]  ;;  %v379_v1 = vmov 0   ;;  %s445_s12 = smov (!%p185_p4, %s369_s12), 1  ;;  %vm216_vm0 = vcmask 130048  }
   0xd   : > { %354 = vset.pattern.permute.xlu0 %v379_v1  ;;  %s327_s18 = sshll.u32 %s445_s12, 3  ;;  %v201_v3 = vld [vmem:[%s437_s1] sm:$0xf] }
   0xe   : > { %207 = vperm.xlu0 %354, %v204_v0   ;;  %s192_s21 = scalar_lea.vmem %s436_s0, %s327_s18  ;;  %s199_s26 = scalar_lea.vmem %s439_s3, %s327_s18 }
   0xf   : > { %v328_v2 = vld [vmem:[%s192_s21] sm:$0xff] }
  0x10   : > { %227 = vmatpush.bf16.msra.mxu0 %v328_v2 }
  0x13   : > { %324 = vmatmul.msk.bf16.vlgmr.msra.gmra.mxu0 %vm216_vm0, %v201_v3 }
  0x80   : > { %v208_v4 = vpop.permute.xlu0 %207 }
  0x90   : > { %v229_v5 = vpop.f32.mrf.mxu0 }
  0x91   : > { %v230_v6 = vadd.f32 %v229_v5, %v208_v4 }
  0x93   : > { %v233_v7 = vmax.f32 %v230_v6, 0.0 }
  0x95   : > { %234 = vst [vmem:[%s199_s26] sm:$0xff] %v233_v7 }
  0x98   : > { %v231_v8 = vpop.f32.mrf.mxu0 }
  0x99 PF: > { %s13_s14 = sadd.s32 1, %s377_s14   ;;  %s440_s12 = smov %s373_s13 }
  0x9a   : > { %p10_p5 = scmp.ge.s32.totalorder %s13_s14, 4   ;;  %s441_s13 = smov %s443_s15 }
  0x9c   :  { %12 = sbr.rel (!%p10_p5) target bundleno = 2 (0x2), region = 62 }

// kernel: _wavebyol_forward.7
= control target key start
LH: loop header
LB: loop body
LE: loop exit
PB: predicated region body
PF: predicated region fallthrough
CT: control target
= control target key end

     0   :  { %s384_s12 = smov 0   ;;  %s386_s13 = smov 0   ;;  %s423_s0 = inlined_call_operand.vmem [shape: bf16[2,4,128], index: 0, kind: input, shape index: {}]   ;;  %s424_s1 = inlined_call_operand.vmem [shape: bf16[4,4], index: 1, kind: input, shape index: {}]   ;;  %s425_s2 = inlined_call_operand.vmem [shape: f32[4,1], index: 2, kind: input, shape index: {}]   ;;  %s426_s3 = inlined_call_operand.vmem [shape: f32[2,4,128], index: 3, kind: output, shape index: {}]  }
   0x1   :  { %s388_s14 = smov 0  }
   0x2 LB: > { %s25_s15 = sadd.s32 1, %s357_s13  ;;  %p307_p0 = scmp.ge.s32.totalorder %s361_s14, 1  ;;  %s361_s14 = sphi %s388_s14, %s13_s14   ;;  %s357_s13 = sphi %s386_s13, %s428_s13   ;;  %s353_s12 = sphi %s384_s12, %s427_s12  }
   0x3   : > { %p27_p1 = scmp.ge.s32.totalorder %s25_s15, 2  ;;  %p155_p2 = scmp.lt.s32.totalorder %s361_s14, 3 }
   0x5   : > { %s430_s15 = smov (%p27_p1, %s25_s15), 0  ;;  %p156_p3 = pnand %p307_p0, %p155_p2 }
   0x6   : > { %p183_p4 = scmp.lt.s32.totalorder (!%p156_p3), %s353_s12, 1 }
   0x7   : > { %159 = sbr.rel (%p156_p3) target bundleno = 154 (0x9a), region = 32 }
   0xc   : > { %v363_v0 = vmov 0   ;;  %v200_v1 = vld [vmem:[%s425_s2] sm:$0xf]  ;;  %s432_s12 = smov (!%p183_p4, %s353_s12), 1  ;;  %vm210_vm0 = vcmask 1041408   ;;  %vm206_vm1 = vcmask 31744  }
   0xd   : > { %338 = vset.pattern.permute.xlu0 %v363_v0  ;;  %s308_s18 = sshll.u32 %s432_s12, 1  ;;  %v198_v4 = vld [vmem:[%s424_s1] sm:$0x3]  ;;  %s309_s24 = sshll.u32 %s432_s12, 2 }
   0xe   : > { %203 = vperm.xlu0 %338, %v200_v1   ;;  %s189_s21 = scalar_lea.vmem %s423_s0, %s308_s18  ;;  %s196_s27 = scalar_lea.vmem %s426_s3, %s309_s24 }
   0xf   : > { %v199_v2 = vld [vmem:[%s189_s21] sm:$0x3] }
  0x10   : > { %v212_v3 = vsel %vm210_vm0, %v199_v2, 0 }
  0x11   : > { %221 = vmatpush.bf16.msra.mxu0 %v212_v3 }
  0x14   : > { %310 = vmatmul.msk.bf16.vlgmr.msra.gmra.mxu0 %vm206_vm1, %v198_v4 }
  0x80   : > { %v204_v5 = vpop.permute.xlu0 %203 }
  0x91   : > { %v223_v6 = vpop.f32.mrf.mxu0 }
  0x92   : > { %v224_v7 = vadd.f32 %v223_v6, %v204_v5 }
  0x94   : > { %v227_v8 = vmax.f32 %v224_v7, 0.0 }
  0x96   : > { %228 = vst [vmem:[%s196_s27] sm:$0xf] %v227_v8 }
  0x99   : > { %v225_v9 = vpop.f32.mrf.mxu0 }
  0x9a PF: > { %s13_s14 = sadd.s32 1, %s361_s14   ;;  %s427_s12 = smov %s357_s13 }
  0x9b   : > { %p10_p5 = scmp.ge.s32.totalorder %s13_s14, 4   ;;  %s428_s13 = smov %s430_s15 }
  0x9d   :  { %12 = sbr.rel (!%p10_p5) target bundleno = 2 (0x2), region = 62 }

// kernel: _wavebyol_forward.9
= control target key start
LH: loop header
LB: loop body
LE: loop exit
PB: predicated region body
PF: predicated region fallthrough
CT: control target
= control target key end

     0   :  { %vm53_vm0 = vcmask 254976   ;;  %v780_v2 = vmov 0.0   ;;  %s993_s0 = inlined_call_operand.vmem [shape: bf16[2,128], index: 0, kind: input, shape index: {}]   ;;  %s994_s1 = inlined_call_operand.vmem [shape: bf16[2,128], index: 1, kind: input, shape index: {}]   ;;  %s995_s2 = inlined_call_operand.vmem [shape: bf16[128,32], index: 2, kind: input, shape index: {}]   ;;  %s996_s3 = inlined_call_operand.vmem [shape: f32[1,32], index: 3, kind: input, shape index: {}]   ;;  %s997_s4 = inlined_call_operand.vmem [shape: f32[1,32], index: 4, kind: input, shape index: {}]   ;;  %s998_s5 = inlined_call_operand.vmem [shape: f32[1,32], index: 5, kind: input, shape index: {}]   ;;  %s999_s6 = inlined_call_operand.vmem [shape: bf16[32,16], index: 6, kind: input, shape index: {}]   ;;  %s1000_s7 = inlined_call_operand.vmem [shape: f32[1,16], index: 7, kind: input, shape index: {}]   ;;  %s1001_s8 = inlined_call_operand.vmem [shape: bf16[16,32], index: 8, kind: input, shape index: {}]   ;;  %s1002_s9 = inlined_call_operand.vmem [shape: f32[1,32], index: 9, kind: input, shape index: {}]   ;;  %s1003_s10 = inlined_call_operand.vmem [shape: f32[1,32], index: 10, kind: input, shape index: {}]   ;;  %s1004_s11 = inlined_call_operand.vmem [shape: f32[1,32], index: 11, kind: input, shape index: {}]   ;;  %s1005_s12 = inlined_call_operand.vmem [shape: bf16[32,16], index: 12, kind: input, shape index: {}]   ;;  %s1006_s13 = inlined_call_operand.vmem [shape: f32[1,16], index: 13, kind: input, shape index: {}]   ;;  %s1007_s14 = inlined_call_operand.hbm [shape: f32[1,1], index: 14, kind: output, shape index: {}]  }
   0x1   :  { %v711_v0 = vld [vmem:[%s995_s2 + $0x38] sm:$0xff]  ;;  %v710_v1 = vld [vmem:[%s995_s2 + $0x30] sm:$0xff]  ;;  %54 = vst.msk [vmem:[#allocation2] sm:$0x3] %vm53_vm0, %v780_v2  ;;  %v709_v3 = vld [vmem:[%s995_s2 + $0x28] sm:$0xff] }
   0x2   :  { %122 = vmatpush.bf16.msra.mxu0 %v711_v0  ;;  %140 = vmatpush.bf16.msra.mxu1 %v711_v0  ;;  %55 = vst.msk [vmem:[#allocation3] sm:$0x3] %vm53_vm0, %v780_v2 }
   0x6   :  { %123 = vmatpush.bf16.msra.mxu0 %v710_v1  ;;  %141 = vmatpush.bf16.msra.mxu1 %v710_v1 }
   0x7   :  { %19 = vsyncpa [#allocation5], 0  ;;  %v708_v4 = vld [vmem:[%s995_s2 + $0x20] sm:$0xff]  ;;  %v707_v5 = vld [vmem:[%s995_s2 + $0x18] sm:$0xff]  ;;  %v781_v15 = vmov 2.0   ;;  %vm233_vm8 = vcmask 261120  }
   0x8   :  { %v706_v6 = vld [vmem:[%s995_s2 + $0x10] sm:$0xff]  ;;  %v705_v7 = vld [vmem:[%s995_s2 + $0x8] sm:$0xff]  ;;  %v704_v8 = vld [vmem:[%s995_s2] sm:$0xff]  ;;  %728 = vrcp.f32 %v781_v15  ;;  %vm315_vm9 = vcmask 130048   ;;  %s637_s17 = sshll.u32 %s1007_s14, 4  ;;  %s638_s17 = int_to_ptr.hbm [resolvable:$true] %s637_s17 }
   0x9   :  { %v73_v9 = vld [vmem:[%s993_s0] sm:$0x1]  ;;  %v713_v11 = vld [vmem:[%s999_s6 + $0x8] sm:$0xff]  ;;  %v138_v14 = vld [vmem:[#allocation3] sm:$0x3] }
   0xa   :  { %124 = vmatpush.bf16.msra.mxu0 %v709_v3  ;;  %142 = vmatpush.bf16.msra.mxu1 %v709_v3  ;;  %v139_v10 = vld [vmem:[%s994_s1] sm:$0x1] }
   0xb   :  { %243 = vmatpush.bf16.msra.mxu2 %v713_v11  ;;  %295 = vmatpush.bf16.msra.mxu3 %v713_v11  ;;  %v712_v12 = vld [vmem:[%s999_s6] sm:$0xff] }
   0xc   :  { %v72_v13 = vld [vmem:[#allocation2] sm:$0x3] }
   0xd   :  { %v720_v21 = vld [vmem:[%s996_s3] ss:$0 sm:$0xff] }
   0xe   :  { %125 = vmatpush.bf16.msra.mxu0 %v708_v4  ;;  %143 = vmatpush.bf16.msra.mxu1 %v708_v4  ;;  %v729_v20 = vpop.eup %728  ;;  %v714_v3 = vld [vmem:[%s1001_s8] sm:$0xff] }
   0xf   :  { %244 = vmatpush.bf16.msra.mxu2 %v712_v12  ;;  %296 = vmatpush.bf16.msra.mxu3 %v712_v12  ;;  %v174_v22 = vmul.f32 2.0, %v729_v20  ;;  %vm178_vm1 = vweird.f32 %v729_v20  ;;  %v721_v15 = vld [vmem:[%s997_s4] ss:$0 sm:$0xff] }
  0x11   :  { %v175_v27 = vsub.f32 1.0, %v174_v22 }
  0x12   :  { %126 = vmatpush.bf16.msra.mxu0 %v707_v5  ;;  %144 = vmatpush.bf16.msra.mxu1 %v707_v5 }
  0x13   :  { %v176_v33 = vmul.f32 %v729_v20, %v175_v27  ;;  %326 = vmatpush.bf16.msrb.mxu2 %v714_v3 }
  0x15   :  { %v177_v38 = vadd.f32 %v729_v20, %v176_v33 }
  0x16   :  { %127 = vmatpush.bf16.msra.mxu0 %v706_v6  ;;  %145 = vmatpush.bf16.msra.mxu1 %v706_v6 }
  0x17   :  { %v903_v43 = vsel %vm178_vm1, %v729_v20, %v177_v38 }
  0x1a   :  { %128 = vmatpush.bf16.msra.mxu0 %v705_v7  ;;  %146 = vmatpush.bf16.msra.mxu1 %v705_v7 }
  0x1e   :  { %129 = vmatpush.bf16.msra.mxu0 %v704_v8  ;;  %147 = vmatpush.bf16.msra.mxu1 %v704_v8 }
  0x21   :  { %130 = vmatmul.bf16.vlgmr.msra.gmra.mxu0 %v73_v9  ;;  %148 = vmatmul.bf16.vlgmr.msra.gmra.mxu1 %v139_v10 }
  0x9e   :  { %v131_v16 = vpop.f32.mrf.mxu0  ;;  %v149_v17 = vpop.f32.mrf.mxu1 }
  0x9f   :  { %v135_v18 = vadd.f32 %v131_v16, %v72_v13  ;;  %v153_v19 = vadd.f32 %v149_v17, %v138_v14 }
  0xa1   :  { %137 = vst.msk [vmem:[#allocation2] sm:$0x3] %vm53_vm0, %v135_v18 }
  0xa2   :  { %154 = vst.msk [vmem:[#allocation3] sm:$0x3] %vm53_vm0, %v153_v19 }
  0xa6   :  { %v133_v23 = vpop.f32.mrf.mxu0  ;;  %v151_v24 = vpop.f32.mrf.mxu1 }
  0xa8   :  { %v158_v25 = vld [vmem:[#allocation2] sm:$0x3] }
  0xa9   :  { %v163_v26 = vadd.f32 %v720_v21, %v158_v25  ;;  %v250_v28 = vld [vmem:[#allocation3] sm:$0x3] }
  0xaa   :  { %v251_v29 = vadd.f32 %v720_v21, %v250_v28  ;;  %v722_v21 = vld [vmem:[%s998_s5] ss:$0 sm:$0xff] }
  0xab   :  { %v166_v30 = vsel %vm53_vm0, %v163_v26, 0.0 }
  0xac   :  { %v167_v31 = vrot.slane %v166_v30, 4  ;;  %v252_v32 = vsel %vm53_vm0, %v251_v29, 0.0 }
  0xad   :  { %v253_v34 = vrot.slane %v252_v32, 4 }
  0xae   :  { %v168_v35 = vadd.f32 %v167_v31, %v166_v30 }
  0xaf   :  { %v254_v36 = vadd.f32 %v253_v34, %v252_v32  ;;  %v723_v34 = vld [vmem:[%s1000_s7] ss:$0 sm:$0xff] }
  0xb0   :  { %v169_v37 = vrot.slane %v168_v35, 2 }
  0xb1   :  { %v255_v39 = vrot.slane %v254_v36, 2 }
  0xb2   :  { %v170_v40 = vadd.f32 %v169_v37, %v168_v35 }
  0xb3   :  { %v256_v41 = vadd.f32 %v255_v39, %v254_v36 }
  0xb4   :  { %v171_v42 = vrot.slane %v170_v40, 1 }
  0xb5   :  { %v257_v44 = vrot.slane %v256_v41, 1 }
  0xb6   :  { %v172_v45 = vadd.f32 %v171_v42, %v170_v40 }
  0xb7   :  { %v258_v46 = vadd.f32 %v257_v44, %v256_v41  ;;  %v724_v44 = vld [vmem:[%s1002_s9] ss:$0 sm:$0xff] }
  0xb8   :  { %v180_v47 = vmul.f32 %v903_v43, %v172_v45 }
  0xb9   :  { %v259_v48 = vmul.f32 %v258_v46, %v903_v43 }
  0xba   :  { %v181_v49 = vsub.f32 %v163_v26, %v180_v47 }
  0xbb   :  { %v260_v50 = vsub.f32 %v251_v29, %v259_v48 }
  0xbc   :  { %v182_v51 = vmul.f32 %v181_v49, %v181_v49  ;;  %v194_v20 = vmul.f32 %v721_v15, %v181_v49 }
  0xbd   :  { %v261_v52 = vmul.f32 %v260_v50, %v260_v50  ;;  %v270_v24 = vmul.f32 %v721_v15, %v260_v50 }
  0xbe   :  { %v183_v53 = vsel %vm53_vm0, %v182_v51, 0.0 }
  0xbf   :  { %v184_v54 = vrot.slane %v183_v53, 4  ;;  %v262_v55 = vsel %vm53_vm0, %v261_v52, 0.0 }
  0xc0   :  { %v263_v56 = vrot.slane %v262_v55, 4 }
  0xc1   :  { %v185_v57 = vadd.f32 %v184_v54, %v183_v53 }
  0xc2   :  { %v264_v58 = vadd.f32 %v263_v56, %v262_v55 }
  0xc3   :  { %v186_v59 = vrot.slane %v185_v57, 2 }
  0xc4   :  { %v265_v60 = vrot.slane %v264_v58, 2 }
  0xc5   :  { %v187_v61 = vadd.f32 %v186_v59, %v185_v57 }
  0xc6   :  { %v266_v62 = vadd.f32 %v265_v60, %v264_v58 }
  0xc7   :  { %v188_v63 = vrot.slane %v187_v61, 1 }
  0xc8   :  { %v267_v0 = vrot.slane %v266_v62, 1 }
  0xc9   :  { %v189_v1 = vadd.f32 %v188_v63, %v187_v61 }
  0xca   :  { %v268_v2 = vadd.f32 %v267_v0, %v266_v62 }
  0xcb   :  { %v190_v4 = vmul.f32 %v189_v1, %v903_v43 }
  0xcc   :  { %v269_v5 = vmul.f32 %v268_v2, %v903_v43 }
  0xcd   :  { %v195_v6 = vadd.f32 1e-05, %v190_v4  ;;  %v716_v4 = vld [vmem:[%s1005_s12 + $0x8] sm:$0xff] }
  0xce   :  { %v271_v7 = vadd.f32 1e-05, %v269_v5  ;;  %403 = vmatpush.bf16.msrb.mxu3 %v716_v4 }
  0xcf   :  { %730 = vrsqrt.f32 %v195_v6  ;;  %vm202_vm4 = vweird.f32 %v195_v6 }
  0xd0   :  { %732 = vrsqrt.f32 %v271_v7  ;;  %vm278_vm6 = vweird.f32 %v271_v7 }
  0xd5   :  { %v731_v8 = vpop.eup %730 }
  0xd6   :  { %v733_v9 = vpop.eup %732  ;;  %v197_v10 = vmul.f32 %v731_v8, %v195_v6  ;;  %vm203_vm2 = vweird.f32 %v731_v8 }
  0xd7   :  { %v273_v11 = vmul.f32 %v733_v9, %v271_v7  ;;  %vm279_vm3 = vweird.f32 %v733_v9  ;;  %vm204_vm5 = vmor %vm202_vm4, %vm203_vm2 }
  0xd8   :  { %v198_v12 = vmul.f32 %v731_v8, %v197_v10  ;;  %vm280_vm7 = vmor %vm278_vm6, %vm279_vm3 }
  0xd9   :  { %v274_v13 = vmul.f32 %v733_v9, %v273_v11 }
  0xda   :  { %v199_v14 = vmul.f32 0.5, %v198_v12 }
  0xdb   :  { %v275_v16 = vmul.f32 0.5, %v274_v13 }
  0xdc   :  { %v200_v17 = vsub.f32 1.5, %v199_v14 }
  0xdd   :  { %v276_v18 = vsub.f32 1.5, %v275_v16 }
  0xde   :  { %v201_v19 = vmul.f32 %v731_v8, %v200_v17 }
  0xdf   :  { %v277_v22 = vmul.f32 %v733_v9, %v276_v18 }
  0xe0   :  { %v205_v23 = vsel %vm204_vm5, %v731_v8, %v201_v19 }
  0xe1   :  { %v206_v25 = vmul.f32 %v205_v23, %v194_v20  ;;  %v281_v26 = vsel %vm280_vm7, %v733_v9, %v277_v22  ;;  %v715_v9 = vld [vmem:[%s1005_s12] sm:$0xff] }
  0xe2   :  { %v282_v27 = vmul.f32 %v281_v26, %v270_v24  ;;  %404 = vmatpush.bf16.msrb.mxu3 %v715_v9 }
  0xe3   :  { %v210_v28 = vadd.f32 %v722_v21, %v206_v25 }
  0xe4   :  { %v283_v29 = vadd.f32 %v722_v21, %v282_v27 }
  0xe5   :  { %v211_v30 = vmax.f32 %v210_v28, 0.0 }
  0xe6   :  { %v284_v31 = vmax.f32 %v283_v29, 0.0  ;;  %v725_v29 = vld [vmem:[%s1003_s10] ss:$0 sm:$0xff] }
  0xe7   :  { %v212_v32 = vpack.c.bf16 %v211_v30, %v211_v30 }
  0xe8   :  { %v285_v33 = vpack.c.bf16 %v284_v31, %v284_v31 }
  0xe9   :  { %686 = vmatmul.msk.bf16.vlgmr.msra.gmra.mxu2 %vm233_vm8, %v212_v32 }
  0xea   :  { %687 = vmatmul.msk.bf16.vlgmr.msra.gmra.mxu3 %vm233_vm8, %v285_v33  ;;  %421 = vmatpush.bf16.msra.mxu2 %v714_v3 }
  0xeb   :  { %470 = vmatpush.bf16.msra.mxu3 %v716_v4 }
  0xef   :  { %471 = vmatpush.bf16.msra.mxu3 %v715_v9 }
 0x16c   :  { %v246_v35 = vpop.f32.mrf.mxu2 }
 0x16d   :  { %v925_v36 = vadd.f32 %v723_v34, %v246_v35  ;;  %v298_v37 = vpop.f32.mrf.mxu3  ;;  %v726_v35 = vld [vmem:[%s1004_s11] ss:$0 sm:$0xff] }
 0x16e   :  { %v929_v41 = vadd.f32 %v723_v34, %v298_v37 }
 0x16f   :  { %v302_v38 = vpack.c.bf16 %v925_v36, %v925_v36 }
 0x170   :  { %v410_v42 = vpack.c.bf16 %v929_v41, %v929_v41 }
 0x171   :  { %692 = vmatmul.msk.bf16.vlgmr.msrb.gmra.mxu2 %vm315_vm9, %v302_v38 }
 0x174   :  { %v248_v39 = vpop.f32.mrf.mxu2 }
 0x175   :  { %v300_v40 = vpop.f32.mrf.mxu3 }
 0x181   :  { %702 = vmatmul.msk.bf16.vlgmr.msra.gmra.mxu2 %vm315_vm9, %v410_v42 }
 0x1f4   :  { %v328_v45 = vpop.f32.mrf.mxu2 }
 0x1f5   :  { %v329_v46 = vadd.f32 %v724_v44, %v328_v45 }
 0x1f7   :  { %v334_v47 = vsel %vm53_vm0, %v329_v46, 0.0 }
 0x1f8   :  { %v335_v48 = vrot.slane %v334_v47, 4 }
 0x1fa   :  { %v336_v49 = vadd.f32 %v335_v48, %v334_v47 }
 0x1fc   :  { %v337_v50 = vrot.slane %v336_v49, 2  ;;  %v330_v51 = vpop.f32.mrf.mxu2 }
 0x1fe   :  { %v338_v52 = vadd.f32 %v337_v50, %v336_v49 }
 0x200   :  { %v339_v53 = vrot.slane %v338_v52, 1 }
 0x202   :  { %v340_v54 = vadd.f32 %v339_v53, %v338_v52 }
 0x204   :  { %v341_v55 = vmul.f32 %v340_v54, %v903_v43  ;;  %v423_v56 = vpop.f32.mrf.mxu2 }
 0x205   :  { %v424_v57 = vadd.f32 %v724_v44, %v423_v56  ;;  %v727_v56 = vld [vmem:[%s1006_s13] ss:$0 sm:$0xff]  ;;  %s782_s13 = smov [#allocation4]  }
 0x206   :  { %v342_v58 = vsub.f32 %v329_v46, %v341_v55  ;;  %s635_s30 = sshll.u32 %s782_s13, 4  ;;  %s636_s30 = int_to_ptr.vmem [resolvable:$true] %s635_s30 }
 0x207   :  { %v427_v59 = vsel %vm53_vm0, %v424_v57, 0.0 }
 0x208   :  { %v343_v60 = vmul.f32 %v342_v58, %v342_v58  ;;  %v428_v61 = vrot.slane %v427_v59, 4  ;;  %v355_v34 = vmul.f32 %v725_v29, %v342_v58 }
 0x20a   :  { %v344_v62 = vsel %vm53_vm0, %v343_v60, 0.0  ;;  %v429_v63 = vadd.f32 %v428_v61, %v427_v59 }
 0x20b   :  { %v345_v0 = vrot.slane %v344_v62, 4 }
 0x20c   :  { %v430_v1 = vrot.slane %v429_v63, 2  ;;  %v425_v2 = vpop.f32.mrf.mxu2 }
 0x20d   :  { %v346_v3 = vadd.f32 %v345_v0, %v344_v62  ;;  %v510_v62 = vmul.f32 %v929_v41, %v929_v41 }
 0x20e   :  { %v431_v5 = vadd.f32 %v430_v1, %v429_v63 }
 0x20f   :  { %v347_v6 = vrot.slane %v346_v3, 2 }
 0x210   :  { %v432_v7 = vrot.slane %v431_v5, 1 }
 0x211   :  { %v348_v8 = vadd.f32 %v347_v6, %v346_v3 }
 0x212   :  { %v433_v10 = vadd.f32 %v432_v7, %v431_v5  ;;  %v580_v5 = vmul.f32 %v925_v36, %v925_v36 }
 0x213   :  { %v349_v11 = vrot.slane %v348_v8, 1 }
 0x214   :  { %v434_v12 = vmul.f32 %v433_v10, %v903_v43 }
 0x215   :  { %v350_v13 = vadd.f32 %v349_v11, %v348_v8 }
 0x216   :  { %v435_v14 = vsub.f32 %v424_v57, %v434_v12 }
 0x217   :  { %v351_v15 = vmul.f32 %v350_v13, %v903_v43 }
 0x218   :  { %v436_v16 = vmul.f32 %v435_v14, %v435_v14  ;;  %v445_v50 = vmul.f32 %v725_v29, %v435_v14 }
 0x219   :  { %v356_v17 = vadd.f32 1e-05, %v351_v15 }
 0x21a   :  { %v437_v18 = vsel %vm53_vm0, %v436_v16, 0.0  ;;  %vm478_vm0 = vcmask 123904  }
 0x21b   :  { %734 = vrsqrt.f32 %v356_v17  ;;  %v438_v19 = vrot.slane %v437_v18, 4  ;;  %vm363_vm11 = vweird.f32 %v356_v17  ;;  %v511_v63 = vsel %vm478_vm0, %v510_v62, 0.0 }
 0x21c   :  { %v581_v6 = vsel %vm478_vm0, %v580_v5, 0.0 }
 0x21d   :  { %v439_v20 = vadd.f32 %v438_v19, %v437_v18 }
 0x21f   :  { %v440_v21 = vrot.slane %v439_v20, 2 }
 0x221   :  { %v735_v22 = vpop.eup %734  ;;  %v441_v23 = vadd.f32 %v440_v21, %v439_v20 }
 0x222   :  { %v358_v24 = vmul.f32 %v735_v22, %v356_v17  ;;  %vm364_vm10 = vweird.f32 %v735_v22 }
 0x223   :  { %v442_v25 = vrot.slane %v441_v23, 1  ;;  %vm365_vm12 = vmor %vm363_vm11, %vm364_vm10 }
 0x224   :  { %v359_v26 = vmul.f32 %v735_v22, %v358_v24 }
 0x225   :  { %v443_v27 = vadd.f32 %v442_v25, %v441_v23 }
 0x226   :  { %v360_v28 = vmul.f32 0.5, %v359_v26 }
 0x227   :  { %v444_v30 = vmul.f32 %v443_v27, %v903_v43 }
 0x228   :  { %v361_v31 = vsub.f32 1.5, %v360_v28 }
 0x229   :  { %v446_v32 = vadd.f32 1e-05, %v444_v30 }
 0x22a   :  { %v362_v33 = vmul.f32 %v735_v22, %v361_v31 }
 0x22b   :  { %736 = vrsqrt.f32 %v446_v32  ;;  %vm453_vm14 = vweird.f32 %v446_v32 }
 0x22c   :  { %v366_v37 = vsel %vm365_vm12, %v735_v22, %v362_v33 }
 0x22d   :  { %v367_v38 = vmul.f32 %v366_v37, %v355_v34 }
 0x22f   :  { %v371_v39 = vadd.f32 %v726_v35, %v367_v38 }
 0x231   :  { %v737_v40 = vpop.eup %736  ;;  %v372_v42 = vmax.f32 %v371_v39, 0.0 }
 0x232   :  { %v448_v44 = vmul.f32 %v737_v40, %v446_v32  ;;  %vm454_vm13 = vweird.f32 %v737_v40 }
 0x233   :  { %v373_v45 = vpack.c.bf16 %v372_v42, %v372_v42  ;;  %vm455_vm15 = vmor %vm453_vm14, %vm454_vm13 }
 0x234   :  { %v449_v46 = vmul.f32 %v737_v40, %v448_v44 }
 0x235   :  { %701 = vmatmul.msk.bf16.vlgmr.msrb.gmra.mxu3 %vm233_vm8, %v373_v45 }
 0x236   :  { %v450_v47 = vmul.f32 0.5, %v449_v46 }
 0x238   :  { %v451_v48 = vsub.f32 1.5, %v450_v47 }
 0x23a   :  { %v452_v49 = vmul.f32 %v737_v40, %v451_v48 }
 0x23c   :  { %v456_v51 = vsel %vm455_vm15, %v737_v40, %v452_v49 }
 0x23d   :  { %v457_v52 = vmul.f32 %v456_v51, %v445_v50 }
 0x23f   :  { %v458_v53 = vadd.f32 %v726_v35, %v457_v52 }
 0x241   :  { %v459_v54 = vmax.f32 %v458_v53, 0.0 }
 0x243   :  { %v460_v55 = vpack.c.bf16 %v459_v54, %v459_v54 }
 0x245   :  { %703 = vmatmul.msk.bf16.vlgmr.msra.gmra.mxu3 %vm233_vm8, %v460_v55 }
 0x2b8   :  { %v406_v57 = vpop.f32.mrf.mxu3 }
 0x2b9   :  { %v961_v58 = vadd.f32 %v727_v56, %v406_v57 }
 0x2bb   :  { %v477_v59 = vmul.f32 %v961_v58, %v961_v58 }
 0x2bd   :  { %v479_v60 = vsel %vm478_vm0, %v477_v59, 0.0 }
 0x2be   :  { %480 = vadd.xlane.f32.xlu0 %v479_v60 }
 0x2c0   :  { %v408_v61 = vpop.f32.mrf.mxu3 }
 0x2c6   :  { %512 = vadd.xlane.f32.xlu0 %v511_v63 }
 0x2c8   :  { %v473_v0 = vpop.f32.mrf.mxu3 }
 0x2c9   :  { %v969_v1 = vadd.f32 %v727_v56, %v473_v0 }
 0x2cb   :  { %v548_v2 = vmul.f32 %v969_v1, %v969_v1 }
 0x2cd   :  { %v549_v3 = vsel %vm478_vm0, %v548_v2, 0.0 }
 0x2ce   :  { %550 = vadd.xlane.f32.xlu1 %v549_v3 }
 0x2d0   :  { %v475_v4 = vpop.f32.mrf.mxu3 }
 0x2d6   :  { %582 = vadd.xlane.f32.xlu1 %v581_v6 }
 0x331   :  { %v481_v7 = vpop.xlane.xlu0 %480 }
 0x332   :  { %738 = vrsqrt.f32 %v481_v7  ;;  %vm489_vm1 = vcmp.eq.f32.partialorder %v481_v7, inf  ;;  %v492_v20 = vand.u32 2147483648, %v481_v7  ;;  %vm491_vm2 = vcmp.eq.f32.partialorder %v481_v7, 0.0 }
 0x338   :  { %v739_v8 = vpop.eup %738 }
 0x339   :  { %v483_v9 = vmul.f32 %v739_v8, %v481_v7  ;;  %v513_v10 = vpop.xlane.xlu0 %512 }
 0x33a   :  { %740 = vrsqrt.f32 %v513_v10  ;;  %vm521_vm3 = vcmp.eq.f32.partialorder %v513_v10, inf  ;;  %v524_v32 = vand.u32 2147483648, %v513_v10  ;;  %vm523_vm4 = vcmp.eq.f32.partialorder %v513_v10, 0.0 }
 0x33b   :  { %v484_v11 = vmul.f32 %v739_v8, %v483_v9 }
 0x33d   :  { %v485_v12 = vmul.f32 0.5, %v484_v11 }
 0x33f   :  { %v486_v13 = vsub.f32 1.5, %v485_v12 }
 0x340   :  { %v741_v14 = vpop.eup %740 }
 0x341   :  { %v487_v15 = vmul.f32 %v739_v8, %v486_v13  ;;  %v515_v16 = vmul.f32 %v741_v14, %v513_v10  ;;  %v551_v17 = vpop.xlane.xlu1 %550 }
 0x342   :  { %742 = vrsqrt.f32 %v551_v17  ;;  %vm559_vm5 = vcmp.eq.f32.partialorder %v551_v17, inf  ;;  %v562_v49 = vand.u32 2147483648, %v551_v17  ;;  %vm561_vm6 = vcmp.eq.f32.partialorder %v551_v17, 0.0 }
 0x343   :  { %v488_v18 = vmul.f32 %v487_v15, %v481_v7  ;;  %v516_v19 = vmul.f32 %v741_v14, %v515_v16 }
 0x345   :  { %v490_v21 = vsel %vm489_vm1, %v481_v7, %v488_v18  ;;  %v517_v22 = vmul.f32 0.5, %v516_v19 }
 0x346   :  { %v493_v23 = vsel %vm491_vm2, %v492_v20, %v490_v21 }
 0x347   :  { %v494_v24 = vmax.f32 %v493_v23, 1e-08  ;;  %v518_v25 = vsub.f32 1.5, %v517_v22 }
 0x348   :  { %v743_v26 = vpop.eup %742 }
 0x349   :  { %744 = vrcp.f32 %v494_v24  ;;  %v519_v27 = vmul.f32 %v741_v14, %v518_v25  ;;  %v553_v28 = vmul.f32 %v743_v26, %v551_v17  ;;  %v583_v29 = vpop.xlane.xlu1 %582  ;;  %v506_v61 = vand.u32 2147483648, %v494_v24 }
 0x34a   :  { %746 = vrsqrt.f32 %v583_v29  ;;  %vm500_vm8 = vweird.f32 %v494_v24  ;;  %v504_v62 = vand.u32 2147483647, %v494_v24  ;;  %vm591_vm9 = vcmp.eq.f32.partialorder %v583_v29, inf }
 0x34b   :  { %v520_v30 = vmul.f32 %v519_v27, %v513_v10  ;;  %v554_v31 = vmul.f32 %v743_v26, %v553_v28  ;;  %v594_v2 = vand.u32 2147483648, %v583_v29  ;;  %vm593_vm12 = vcmp.eq.f32.partialorder %v583_v29, 0.0 }
 0x34c   :  { %v507_v9 = vor.u32 1.1754944e-38, %v506_v61  ;;  %vm505_vm13 = vcmp.eq.f32.partialorder %v504_v62, 8.507059e+37 }
 0x34d   :  { %v522_v33 = vsel %vm521_vm3, %v513_v10, %v520_v30  ;;  %v555_v34 = vmul.f32 0.5, %v554_v31 }
 0x34e   :  { %v525_v35 = vsel %vm523_vm4, %v524_v32, %v522_v33 }
 0x34f   :  { %v745_v37 = vpop.eup %744  ;;  %v526_v38 = vmax.f32 %v525_v35, 1e-08  ;;  %v556_v39 = vsub.f32 1.5, %v555_v34 }
 0x350   :  { %v747_v40 = vpop.eup %746  ;;  %v496_v42 = vmul.f32 %v745_v37, %v494_v24  ;;  %vm501_vm7 = vweird.f32 %v745_v37 }
 0x351   :  { %748 = vrcp.f32 %v526_v38  ;;  %v557_v44 = vmul.f32 %v743_v26, %v556_v39  ;;  %v585_v45 = vmul.f32 %v747_v40, %v583_v29  ;;  %vm977_vm10 = vmor %vm500_vm8, %vm501_vm7  ;;  %v538_v4 = vand.u32 2147483648, %v526_v38 }
 0x352   :  { %v497_v46 = vsub.f32 1.0, %v496_v42  ;;  %v536_v7 = vand.u32 2147483647, %v526_v38  ;;  %vm532_vm14 = vweird.f32 %v526_v38 }
 0x353   :  { %v558_v47 = vmul.f32 %v557_v44, %v551_v17  ;;  %v586_v48 = vmul.f32 %v747_v40, %v585_v45  ;;  %v539_v15 = vor.u32 1.1754944e-38, %v538_v4 }
 0x354   :  { %v498_v50 = vmul.f32 %v745_v37, %v497_v46  ;;  %vm537_vm1 = vcmp.eq.f32.partialorder %v536_v7, 8.507059e+37 }
 0x355   :  { %v560_v51 = vsel %vm559_vm5, %v551_v17, %v558_v47  ;;  %v587_v52 = vmul.f32 0.5, %v586_v48 }
 0x356   :  { %v563_v53 = vsel %vm561_vm6, %v562_v49, %v560_v51  ;;  %v499_v57 = vadd.f32 %v745_v37, %v498_v50 }
 0x357   :  { %v749_v54 = vpop.eup %748  ;;  %v564_v55 = vmax.f32 %v563_v53, 1e-08  ;;  %v588_v56 = vsub.f32 1.5, %v587_v52 }
 0x358   :  { %v528_v59 = vmul.f32 %v749_v54, %v526_v38  ;;  %v503_v5 = vsel %vm977_vm10, %v745_v37, %v499_v57  ;;  %vm533_vm11 = vweird.f32 %v749_v54  ;;  %vm619_vm10 = vcmask 1041408  }
 0x359   :  { %750 = vrcp.f32 %v564_v55  ;;  %v589_v60 = vmul.f32 %v747_v40, %v588_v56  ;;  %v508_v14 = vsel %vm505_vm13, %v507_v9, %v503_v5  ;;  %vm534_vm15 = vmor %vm532_vm14, %vm533_vm11  ;;  %v576_v28 = vand.u32 2147483648, %v564_v55 }
 0x35a   :  { %v529_v63 = vsub.f32 1.0, %v528_v59  ;;  %v509_v19 = vmul.f32 %v508_v14, %v961_v58  ;;  %vm570_vm3 = vweird.f32 %v564_v55 }
 0x35b   :  { %v590_v0 = vmul.f32 %v589_v60, %v583_v29  ;;  %v577_v33 = vor.u32 1.1754944e-38, %v576_v28 }
 0x35c   :  { %v530_v6 = vmul.f32 %v749_v54, %v529_v63 }
 0x35d   :  { %v592_v8 = vsel %vm591_vm9, %v583_v29, %v590_v0  ;;  %v574_v29 = vand.u32 2147483647, %v564_v55 }
 0x35e   :  { %v595_v10 = vsel %vm593_vm12, %v594_v2, %v592_v8  ;;  %v531_v11 = vadd.f32 %v749_v54, %v530_v6 }
 0x35f   :  { %v751_v12 = vpop.eup %750  ;;  %v596_v13 = vmax.f32 %v595_v10, 1e-08  ;;  %vm575_vm6 = vcmp.eq.f32.partialorder %v574_v29, 8.507059e+37 }
 0x360   :  { %v535_v16 = vsel %vm534_vm15, %v749_v54, %v531_v11  ;;  %v566_v17 = vmul.f32 %v751_v12, %v564_v55  ;;  %vm571_vm2 = vweird.f32 %v751_v12 }
 0x361   :  { %752 = vrcp.f32 %v596_v13  ;;  %v540_v18 = vsel %vm537_vm1, %v539_v15, %v535_v16  ;;  %vm572_vm4 = vmor %vm570_vm3, %vm571_vm2  ;;  %v608_v31 = vand.u32 2147483648, %v596_v13  ;;  %vm602_vm7 = vweird.f32 %v596_v13 }
 0x362   :  { %v541_v20 = vmul.f32 %v540_v18, %v929_v41  ;;  %v567_v21 = vsub.f32 1.0, %v566_v17  ;;  %v606_v41 = vand.u32 2147483647, %v596_v13 }
 0x363   :  { %v609_v37 = vor.u32 1.1754944e-38, %v608_v31 }
 0x364   :  { %v542_v22 = vmul.f32 %v541_v20, %v509_v19  ;;  %v568_v23 = vmul.f32 %v751_v12, %v567_v21  ;;  %vm607_vm9 = vcmp.eq.f32.partialorder %v606_v41, 8.507059e+37 }
 0x366   :  { %v543_v24 = vsel %vm478_vm0, %v542_v22, 0.0  ;;  %v569_v26 = vadd.f32 %v751_v12, %v568_v23 }
 0x367   :  { %v753_v25 = vpop.eup %752  ;;  %544 = vadd.xlane.f32.xlu2 %v543_v24 }
 0x368   :  { %v598_v27 = vmul.f32 %v753_v25, %v596_v13  ;;  %v573_v32 = vsel %vm572_vm4, %v751_v12, %v569_v26  ;;  %vm603_vm5 = vweird.f32 %v753_v25 }
 0x369   :  { %v578_v35 = vsel %vm575_vm6, %v577_v33, %v573_v32  ;;  %vm604_vm8 = vmor %vm602_vm7, %vm603_vm5 }
 0x36a   :  { %v599_v30 = vsub.f32 1.0, %v598_v27  ;;  %v579_v40 = vmul.f32 %v578_v35, %v969_v1 }
 0x36c   :  { %v600_v58 = vmul.f32 %v753_v25, %v599_v30 }
 0x36e   :  { %v601_v34 = vadd.f32 %v753_v25, %v600_v58 }
 0x370   :  { %v605_v38 = vsel %vm604_vm8, %v753_v25, %v601_v34 }
 0x371   :  { %v610_v39 = vsel %vm607_vm9, %v609_v37, %v605_v38 }
 0x372   :  { %v611_v42 = vmul.f32 %v610_v39, %v925_v36 }
 0x374   :  { %v612_v44 = vmul.f32 %v611_v42, %v579_v40 }
 0x376   :  { %v613_v45 = vsel %vm478_vm0, %v612_v44, 0.0  ;;  %vm628_vm0 = vcmask 0  }
 0x377   :  { %614 = vadd.xlane.f32.xlu2 %v613_v45 }
 0x3da   :  { %v545_v46 = vpop.xlane.xlu2 %544 }
 0x3db   :  { %v546_v47 = vmul.f32 2.0, %v545_v46 }
 0x3dd   :  { %v547_v50 = vsub.f32 2.0, %v546_v47 }
 0x3ea   :  { %v615_v48 = vpop.xlane.xlu2 %614 }
 0x3eb   :  { %v616_v49 = vmul.f32 2.0, %v615_v48 }
 0x3ed   :  { %v617_v51 = vsub.f32 2.0, %v616_v49 }
 0x3ef   :  { %v618_v52 = vadd.f32 %v617_v51, %v547_v50 }
 0x3f1   :  { %v620_v53 = vsel %vm619_vm10, %v618_v52, 0.0 }
 0x3f2   :  { %v621_v54 = vrot.slane %v620_v53, 4 }
 0x3f4   :  { %v622_v55 = vadd.f32 %v621_v54, %v620_v53 }
 0x3f6   :  { %v623_v56 = vrot.slane %v622_v55, 2 }
 0x3f8   :  { %v624_v57 = vadd.f32 %v623_v56, %v622_v55 }
 0x3fa   :  { %v625_v1 = vrot.slane %v624_v57, 1 }
 0x3fc   :  { %v626_v36 = vadd.f32 %v625_v1, %v624_v57 }
 0x3fe   :  { %v627_v59 = vmul.f32 %v626_v36, %v903_v43 }
 0x400   :  { %629 = vst.msk [vmem:[#allocation4] sm:$0x1] %vm628_vm0, %v627_v59 }
 0x401   :  { %640 = dma.vmem_to_hbm [thread:$0]  %s636_s30, 16, %s638_s17, [#allocation5]  }
 0x402   :  { %778 = dma.done.wait [#allocation5], 16  }
 0x403   :  { %779 = vsyncadd [#allocation5], 4294967280 }
 0x404   :  { %645 = vsyncpa [#allocation5], 1 }

</bundles_post_ra>
